<compile_context>
chip_gen: v6e
topology: v6e:2x2x1
jax: 0.10.0
libtpu: 0.0.40
codegen_flags: <defaults>
</compile_context>

<pallas_src>
import jax
import jax.numpy as jnp
from jax.experimental import pallas as pl
from jax.experimental.pallas import tpu as pltpu  # noqa: F401  (TPU backend)

EPS = 1e-5


def _fused_kernel(x_ref, w_ref, gamma_ref, beta_ref, o_ref):
    # x_ref:     (Cin, M)   float32   (channels on sublanes, pixels on lanes)
    # w_ref:     (Cout, Cin) bfloat16
    # gamma/beta:(Cout, 1)  float32
    # o_ref:     (Cout, M)  float32
    x = jnp.maximum(x_ref[...], 0.0).astype(jnp.bfloat16)            # ReLU + bf16 cast (VPU)
    y = jnp.dot(w_ref[...], x, preferred_element_type=jnp.float32)   # 1x1 conv == matmul (MXU, bf16 in / f32 acc)

    m = y.shape[1]
    inv_m = 1.0 / m
    s = jnp.sum(y, axis=1, keepdims=True)           # (Cout, 1) batch sum per channel
    sq = jnp.sum(y * y, axis=1, keepdims=True)      # (Cout, 1) batch sum of squares
    mean = s * inv_m
    var = sq * inv_m - mean * mean                  # biased variance (PyTorch training-mode BN)
    inv = jax.lax.rsqrt(var + EPS)                  # EUP
    scale = gamma_ref[...] * inv
    shift = beta_ref[...] - mean * scale
    o_ref[...] = (y * scale + shift).astype(o_ref.dtype)


def fused_relu_conv1x1_bn(x_nchw, w_oihw, gamma, beta):
    N, Cin, H, W = x_nchw.shape
    Cout = w_oihw.shape[0]
    assert N == 1, "kernel is specialized for N == 1 (transpose-free reshape path)"
    M = N * H * W

    # Pure reshapes (no data movement / no extra XLA kernels):
    x2d = x_nchw.reshape(Cin, M)                          # (Cin, M)
    w2d = w_oihw.reshape(Cout, Cin).astype(jnp.bfloat16)  # (Cout, Cin), bf16 halves the weight DMA
    g2d = gamma.reshape(Cout, 1)
    b2d = beta.reshape(Cout, 1)

    cost = pl.CostEstimate(
        flops=2 * M * Cin * Cout,
        transcendentals=Cout,                             # rsqrt per output channel
        bytes_accessed=x2d.size * 4 + w2d.size * 2 + M * Cout * 4 + 2 * Cout * 4,
    )

    out2d = pl.pallas_call(
        _fused_kernel,
        out_shape=jax.ShapeDtypeStruct((Cout, M), x_nchw.dtype),
        in_specs=[
            pl.BlockSpec((Cin, M), lambda: (0, 0)),
            pl.BlockSpec((Cout, Cin), lambda: (0, 0)),
            pl.BlockSpec((Cout, 1), lambda: (0, 0)),
            pl.BlockSpec((Cout, 1), lambda: (0, 0)),
        ],
        out_specs=pl.BlockSpec((Cout, M), lambda: (0, 0)),
        cost_estimate=cost,
    )(x2d, w2d, g2d, b2d)

    # (Cout, M) -> (1, Cout, H, W): pure reshape for N == 1.
    return out2d.reshape(N, Cout, H, W)


def _reference_f32(x_nchw, w_oihw, gamma, beta):
    # Exact module semantics in f32 (ReLU -> 1x1 conv -> training-mode BN).
    N, Cin, H, W = x_nchw.shape
    Cout = w_oihw.shape[0]
    x = jnp.maximum(x_nchw, 0.0)
    x2d = jnp.transpose(x, (0, 2, 3, 1)).reshape(-1, Cin)
    y2d = x2d @ jnp.transpose(w_oihw.reshape(Cout, Cin), (1, 0))
    mean = jnp.mean(y2d, axis=0, keepdims=True)
    var = jnp.mean((y2d - mean) ** 2, axis=0, keepdims=True)
    y2d = (y2d - mean) / jnp.sqrt(var + EPS) * gamma.reshape(1, -1) + beta.reshape(1, -1)
    return jnp.transpose(y2d.reshape(N, H, W, Cout), (0, 3, 1, 2))


def _reference_bf16(x_nchw, w_oihw, gamma, beta):
    # Precision-matched reference: same bf16 weight/activation quantization as the
    # kernel, f32 accumulation, same matmul orientation.
    N, Cin, H, W = x_nchw.shape
    Cout = w_oihw.shape[0]
    M = N * H * W
    x2d = jnp.maximum(x_nchw.reshape(Cin, M), 0.0).astype(jnp.bfloat16)
    w2d = w_oihw.reshape(Cout, Cin).astype(jnp.bfloat16)
    y = jnp.dot(w2d, x2d, preferred_element_type=jnp.float32)      # (Cout, M)
    mean = jnp.mean(y, axis=1, keepdims=True)
    var = jnp.mean((y - mean) ** 2, axis=1, keepdims=True)
    y = (y - mean) / jnp.sqrt(var + EPS) * gamma.reshape(Cout, 1) + beta.reshape(Cout, 1)
    return y.reshape(N, Cout, H, W)


if __name__ == "__main__":
    key = jax.random.PRNGKey(0)
    k_x, k_w, k_g, k_b = jax.random.split(key, 4)

    # Shapes implied by the module: input (1, 1536, 7, 7), conv 1536->128 (1x1), BN(128).
    N, Cin, H, W = 1, 1536, 7, 7
    Cout = 128

    x = jax.random.normal(k_x, (N, Cin, H, W), dtype=jnp.float32)
    w = jax.random.normal(k_w, (Cout, Cin, 1, 1), dtype=jnp.float32) * 0.02
    gamma = 1.0 + 0.1 * jax.random.normal(k_g, (Cout,), dtype=jnp.float32)
    beta = 0.1 * jax.random.normal(k_b, (Cout,), dtype=jnp.float32)

    out = fused_relu_conv1x1_bn(x, w, gamma, beta)
    out = jax.block_until_ready(out)
    assert out.shape == (N, Cout, H, W)

    # (1) kernel math matches a precision-matched (bf16 matmul inputs) reference tightly
    ref_bf16 = _reference_bf16(x, w, gamma, beta)
    assert jnp.allclose(out, ref_bf16, atol=1e-3, rtol=1e-3)

    # (2) bf16 approximation stays close to the exact f32 module semantics
    ref_f32 = _reference_f32(x, w, gamma, beta)
    assert jnp.allclose(out, ref_f32, atol=2e-2, rtol=2e-2)

    print("KERNEL_OK")
</pallas_src>

<mosaic_0001>
module attributes {stable_mosaic.version = 11 : i64} {
  func.func @_fused_kernel(%arg0: memref<1536x49xf32, #tpu.memory_space<vmem>>, %arg1: memref<128x1536xbf16, #tpu.memory_space<vmem>>, %arg2: memref<128x1xf32, #tpu.memory_space<vmem>>, %arg3: memref<128x1xf32, #tpu.memory_space<vmem>>, %arg4: memref<128x49xf32, #tpu.memory_space<vmem>>) attributes {dimension_semantics = [], scalar_prefetch = 0 : i64, scratch_operands = 0 : i64, tpu.core_type = #tpu.core_type<tc>} {
    %c0 = arith.constant 0 : index
    %c0_0 = arith.constant 0 : index
    %0 = vector.load %arg0[%c0, %c0_0] : memref<1536x49xf32, #tpu.memory_space<vmem>>, vector<1536x49xf32>
    %cst = arith.constant 0.000000e+00 : f32
    %1 = vector.broadcast %cst : f32 to vector<1536x49xf32>
    %2 = arith.maximumf %0, %1 : vector<1536x49xf32>
    %3 = arith.truncf %2 : vector<1536x49xf32> to vector<1536x49xbf16>
    %c0_1 = arith.constant 0 : index
    %c0_2 = arith.constant 0 : index
    %4 = vector.load %arg1[%c0_1, %c0_2] : memref<128x1536xbf16, #tpu.memory_space<vmem>>, vector<128x1536xbf16>
    %cst_3 = arith.constant dense<0.000000e+00> : vector<128x49xf32>
    %5 = tpu.matmul %4, %3, %cst_3 {dimension_numbers = #tpu.dot_dimension_numbers<[1], [0], [0], [1], [0, 0, 1, 1], [], []>} : vector<128x1536xbf16>, vector<1536x49xbf16>, vector<128x49xf32> -> vector<128x49xf32>
    %cst_4 = arith.constant dense<0.000000e+00> : vector<128xf32>
    %6 = vector.multi_reduction <add>, %5, %cst_4 [1] : vector<128x49xf32> to vector<128xf32>
    %7 = vector.shape_cast %6 : vector<128xf32> to vector<128x1xf32>
    %8 = arith.mulf %5, %5 : vector<128x49xf32>
    %cst_5 = arith.constant dense<0.000000e+00> : vector<128xf32>
    %9 = vector.multi_reduction <add>, %8, %cst_5 [1] : vector<128x49xf32> to vector<128xf32>
    %10 = vector.shape_cast %9 : vector<128xf32> to vector<128x1xf32>
    %cst_6 = arith.constant 0.0204081628 : f32
    %11 = vector.broadcast %cst_6 : f32 to vector<128x1xf32>
    %12 = arith.mulf %7, %11 : vector<128x1xf32>
    %cst_7 = arith.constant 0.0204081628 : f32
    %13 = vector.broadcast %cst_7 : f32 to vector<128x1xf32>
    %14 = arith.mulf %10, %13 : vector<128x1xf32>
    %15 = arith.mulf %12, %12 : vector<128x1xf32>
    %16 = arith.subf %14, %15 : vector<128x1xf32>
    %cst_8 = arith.constant 9.99999974E-6 : f32
    %17 = vector.broadcast %cst_8 : f32 to vector<128x1xf32>
    %18 = arith.addf %16, %17 : vector<128x1xf32>
    %19 = math.rsqrt %18 : vector<128x1xf32>
    %c0_9 = arith.constant 0 : index
    %c0_10 = arith.constant 0 : index
    %20 = vector.load %arg2[%c0_9, %c0_10] : memref<128x1xf32, #tpu.memory_space<vmem>>, vector<128x1xf32>
    %21 = arith.mulf %20, %19 : vector<128x1xf32>
    %c0_11 = arith.constant 0 : index
    %c0_12 = arith.constant 0 : index
    %22 = vector.load %arg3[%c0_11, %c0_12] : memref<128x1xf32, #tpu.memory_space<vmem>>, vector<128x1xf32>
    %23 = arith.mulf %12, %21 : vector<128x1xf32>
    %24 = arith.subf %22, %23 : vector<128x1xf32>
    %25 = vector.broadcast %21 : vector<128x1xf32> to vector<128x49xf32>
    %26 = arith.mulf %5, %25 : vector<128x49xf32>
    %27 = vector.broadcast %24 : vector<128x1xf32> to vector<128x49xf32>
    %28 = arith.addf %26, %27 : vector<128x49xf32>
    %c0_13 = arith.constant 0 : index
    %c0_14 = arith.constant 0 : index
    %29 = vector.load %arg4[%c0_13, %c0_14] : memref<128x49xf32, #tpu.memory_space<vmem>>, vector<128x49xf32>
    tpu.vector_store %arg4[%c0_13, %c0_14], %28 {strides = array<i32>} : memref<128x49xf32, #tpu.memory_space<vmem>>, vector<128x49xf32>,
    return
  }
}

</mosaic_0001>

<bundles_post_ra>
// kernel: tpu_custom_call.1
= control target key start
LH: loop header
LB: loop body
LE: loop exit
PB: predicated region body
PF: predicated region fallthrough
CT: control target
= control target key end

     0   :  { %vm1656_vm0 = vcmask 400384   ;;  %s4235_s0 = inlined_call_operand.vmem [shape: f32[1536,49], index: 0, kind: input, shape index: {}]   ;;  %s4236_s1 = inlined_call_operand.vmem [shape: bf16[128,1536], index: 1, kind: input, shape index: {}]   ;;  %s4237_s2 = inlined_call_operand.vmem [shape: f32[128,1], index: 2, kind: input, shape index: {}]   ;;  %s4238_s3 = inlined_call_operand.vmem [shape: f32[128,1], index: 3, kind: input, shape index: {}]   ;;  %s4239_s4 = inlined_call_operand.vmem [shape: f32[128,49], index: 4, kind: output, shape index: {}]  }
   0x1   :  { %v48_v0 = vld [vmem:[%s4235_s0 + $0xf0] sm:$0xff]  ;;  %v49_v1 = vld [vmem:[%s4235_s0 + $0xf8] sm:$0xff]  ;;  %v46_v14 = vld [vmem:[%s4235_s0 + $0xe0] sm:$0xff] }
   0x2   :  { %v80_v2 = vld [vmem:[%s4235_s0 + $0x1f0] sm:$0xff]  ;;  %v240_v3 = vmax.f32 %v48_v0, 0.0  ;;  %v241_v4 = vmax.f32 %v49_v1, 0.0  ;;  %v81_v5 = vld [vmem:[%s4235_s0 + $0x1f8] sm:$0xff]  ;;  %v47_v18 = vld [vmem:[%s4235_s0 + $0xe8] sm:$0xff]  ;;  %v238_v19 = vmax.f32 %v46_v14, 0.0 }
   0x3   :  { %v272_v6 = vmax.f32 %v80_v2, 0.0  ;;  %v32_v7 = vld [vmem:[%s4235_s0 + $0x70] sm:$0xff]  ;;  %v33_v8 = vld [vmem:[%s4235_s0 + $0x78] sm:$0xff]  ;;  %v273_v9 = vmax.f32 %v81_v5, 0.0  ;;  %v78_v20 = vld [vmem:[%s4235_s0 + $0x1e0] sm:$0xff]  ;;  %v239_v24 = vmax.f32 %v47_v18, 0.0 }
   0x4   :  { %v224_v10 = vmax.f32 %v32_v7, 0.0  ;;  %v225_v11 = vmax.f32 %v33_v8, 0.0  ;;  %v64_v12 = vld [vmem:[%s4235_s0 + $0x170] sm:$0xff]  ;;  %v65_v13 = vld [vmem:[%s4235_s0 + $0x178] sm:$0xff]  ;;  %v417_v15 = vpack.c.bf16 %v241_v4, %v240_v3  ;;  %v79_v21 = vld [vmem:[%s4235_s0 + $0x1e8] sm:$0xff]  ;;  %v270_v25 = vmax.f32 %v78_v20, 0.0 }
   0x5   :  { %v256_v16 = vmax.f32 %v64_v12, 0.0  ;;  %v257_v17 = vmax.f32 %v65_v13, 0.0  ;;  %v433_v22 = vpack.c.bf16 %v273_v9, %v272_v6  ;;  %v30_v26 = vld [vmem:[%s4235_s0 + $0x60] sm:$0xff]  ;;  %v31_v27 = vld [vmem:[%s4235_s0 + $0x68] sm:$0xff]  ;;  %v271_v30 = vmax.f32 %v79_v21, 0.0  ;;  %v44_v34 = vld [vmem:[%s4235_s0 + $0xd0] sm:$0xff] }
   0x6   :  { %v409_v23 = vpack.c.bf16 %v225_v11, %v224_v10  ;;  %v62_v28 = vld [vmem:[%s4235_s0 + $0x160] sm:$0xff]  ;;  %2253 = vmatprep.subr.bf16.mxu0 %v417_v15  ;;  %v222_v31 = vmax.f32 %v30_v26, 0.0  ;;  %v223_v32 = vmax.f32 %v31_v27, 0.0  ;;  %v63_v33 = vld [vmem:[%s4235_s0 + $0x168] sm:$0xff]  ;;  %v45_v35 = vld [vmem:[%s4235_s0 + $0xd8] sm:$0xff]  ;;  %v416_v36 = vpack.c.bf16 %v239_v24, %v238_v19 }
   0x7   :  { %v425_v29 = vpack.c.bf16 %v257_v17, %v256_v16  ;;  %2317 = vmatprep.subr.bf16.mxu1 %v433_v22  ;;  %v254_v37 = vmax.f32 %v62_v28, 0.0  ;;  %v255_v38 = vmax.f32 %v63_v33, 0.0  ;;  %v236_v39 = vmax.f32 %v44_v34, 0.0  ;;  %v76_v40 = vld [vmem:[%s4235_s0 + $0x1d0] sm:$0xff]  ;;  %v77_v41 = vld [vmem:[%s4235_s0 + $0x1d8] sm:$0xff]  ;;  %v42_v54 = vld [vmem:[%s4235_s0 + $0xc0] sm:$0xff] }
   0x8   :  { %2254 = vmatpush3.bf16.msra.mxu0 %v409_v23  ;;  %v28_v42 = vld [vmem:[%s4235_s0 + $0x50] sm:$0xff]  ;;  %v432_v43 = vpack.c.bf16 %v271_v30, %v270_v25  ;;  %v408_v44 = vpack.c.bf16 %v223_v32, %v222_v31  ;;  %v237_v45 = vmax.f32 %v45_v35, 0.0  ;;  %v268_v46 = vmax.f32 %v76_v40, 0.0  ;;  %v29_v47 = vld [vmem:[%s4235_s0 + $0x58] sm:$0xff]  ;;  %v43_v55 = vld [vmem:[%s4235_s0 + $0xc8] sm:$0xff] }
   0x9   :  { %2318 = vmatpush3.bf16.msra.mxu1 %v425_v29  ;;  %v60_v48 = vld [vmem:[%s4235_s0 + $0x150] sm:$0xff]  ;;  %v61_v49 = vld [vmem:[%s4235_s0 + $0x158] sm:$0xff]  ;;  %2255 = vmatprep.subr.bf16.mxu0 %v416_v36  ;;  %v424_v50 = vpack.c.bf16 %v255_v38, %v254_v37  ;;  %v269_v51 = vmax.f32 %v77_v41, 0.0  ;;  %v220_v52 = vmax.f32 %v28_v42, 0.0  ;;  %v221_v53 = vmax.f32 %v29_v47, 0.0  ;;  %v74_v56 = vld [vmem:[%s4235_s0 + $0x1c0] sm:$0xff] }
   0xa   :  { %2319 = vmatprep.subr.bf16.mxu1 %v432_v43  ;;  %v415_v57 = vpack.c.bf16 %v237_v45, %v236_v39  ;;  %v252_v58 = vmax.f32 %v60_v48, 0.0  ;;  %v253_v59 = vmax.f32 %v61_v49, 0.0  ;;  %v234_v60 = vmax.f32 %v42_v54, 0.0  ;;  %v75_v61 = vld [vmem:[%s4235_s0 + $0x1c8] sm:$0xff]  ;;  %v26_v62 = vld [vmem:[%s4235_s0 + $0x40] sm:$0xff]  ;;  %v40_v6 = vld [vmem:[%s4235_s0 + $0xb0] sm:$0xff] }
   0xb   :  { %v27_v63 = vld [vmem:[%s4235_s0 + $0x48] sm:$0xff]  ;;  %v431_v0 = vpack.c.bf16 %v269_v51, %v268_v46  ;;  %v407_v1 = vpack.c.bf16 %v221_v53, %v220_v52  ;;  %v235_v2 = vmax.f32 %v43_v55, 0.0  ;;  %v266_v3 = vmax.f32 %v74_v56, 0.0  ;;  %v58_v4 = vld [vmem:[%s4235_s0 + $0x140] sm:$0xff]  ;;  %v41_v11 = vld [vmem:[%s4235_s0 + $0xb8] sm:$0xff] }
   0xc   :  { %2256 = vmatpush3.bf16.msra.mxu0 %v408_v44  ;;  %v59_v5 = vld [vmem:[%s4235_s0 + $0x148] sm:$0xff]  ;;  %v423_v7 = vpack.c.bf16 %v253_v59, %v252_v58  ;;  %v267_v8 = vmax.f32 %v75_v61, 0.0  ;;  %v218_v9 = vmax.f32 %v26_v62, 0.0  ;;  %v219_v10 = vmax.f32 %v27_v63, 0.0  ;;  %v72_v12 = vld [vmem:[%s4235_s0 + $0x1b0] sm:$0xff]  ;;  %v73_v13 = vld [vmem:[%s4235_s0 + $0x1b8] sm:$0xff] }
   0xd   :  { %2320 = vmatpush3.bf16.msra.mxu1 %v424_v50  ;;  %2257 = vmatprep.subr.bf16.mxu0 %v415_v57  ;;  %v414_v14 = vpack.c.bf16 %v235_v2, %v234_v60  ;;  %v250_v15 = vmax.f32 %v58_v4, 0.0  ;;  %v251_v16 = vmax.f32 %v59_v5, 0.0  ;;  %v232_v17 = vmax.f32 %v40_v6, 0.0  ;;  %v24_v18 = vld [vmem:[%s4235_s0 + $0x30] sm:$0xff]  ;;  %v25_v19 = vld [vmem:[%s4235_s0 + $0x38] sm:$0xff]  ;;  %v38_v26 = vld [vmem:[%s4235_s0 + $0xa0] sm:$0xff] }
   0xe   :  { %2321 = vmatprep.subr.bf16.mxu1 %v431_v0  ;;  %v56_v20 = vld [vmem:[%s4235_s0 + $0x130] sm:$0xff]  ;;  %v430_v21 = vpack.c.bf16 %v267_v8, %v266_v3  ;;  %v406_v22 = vpack.c.bf16 %v219_v10, %v218_v9  ;;  %v233_v23 = vmax.f32 %v41_v11, 0.0  ;;  %v264_v24 = vmax.f32 %v72_v12, 0.0  ;;  %v57_v25 = vld [vmem:[%s4235_s0 + $0x138] sm:$0xff]  ;;  %v39_v27 = vld [vmem:[%s4235_s0 + $0xa8] sm:$0xff] }
   0xf   :  { %v422_v28 = vpack.c.bf16 %v251_v16, %v250_v15  ;;  %v265_v29 = vmax.f32 %v73_v13, 0.0  ;;  %v216_v30 = vmax.f32 %v24_v18, 0.0  ;;  %v217_v31 = vmax.f32 %v25_v19, 0.0  ;;  %v70_v32 = vld [vmem:[%s4235_s0 + $0x1a0] sm:$0xff]  ;;  %v71_v33 = vld [vmem:[%s4235_s0 + $0x1a8] sm:$0xff]  ;;  %v36_v45 = vld [vmem:[%s4235_s0 + $0x90] sm:$0xff] }
  0x10   :  { %2258 = vmatpush3.bf16.msra.mxu0 %v407_v1  ;;  %v413_v34 = vpack.c.bf16 %v233_v23, %v232_v17  ;;  %v248_v35 = vmax.f32 %v56_v20, 0.0  ;;  %v249_v36 = vmax.f32 %v57_v25, 0.0  ;;  %v230_v37 = vmax.f32 %v38_v26, 0.0  ;;  %v22_v38 = vld [vmem:[%s4235_s0 + $0x20] sm:$0xff]  ;;  %v23_v39 = vld [vmem:[%s4235_s0 + $0x28] sm:$0xff]  ;;  %v37_v46 = vld [vmem:[%s4235_s0 + $0x98] sm:$0xff] }
  0x11   :  { %2322 = vmatpush3.bf16.msra.mxu1 %v423_v7  ;;  %2259 = vmatprep.subr.bf16.mxu0 %v414_v14  ;;  %v54_v40 = vld [vmem:[%s4235_s0 + $0x120] sm:$0xff]  ;;  %v429_v41 = vpack.c.bf16 %v265_v29, %v264_v24  ;;  %v231_v42 = vmax.f32 %v39_v27, 0.0  ;;  %v262_v43 = vmax.f32 %v70_v32, 0.0  ;;  %v55_v44 = vld [vmem:[%s4235_s0 + $0x128] sm:$0xff]  ;;  %v405_v47 = vpack.c.bf16 %v217_v31, %v216_v30  ;;  %v68_v49 = vld [vmem:[%s4235_s0 + $0x190] sm:$0xff] }
  0x12   :  { %2323 = vmatprep.subr.bf16.mxu1 %v430_v21  ;;  %v263_v48 = vmax.f32 %v71_v33, 0.0  ;;  %v69_v50 = vld [vmem:[%s4235_s0 + $0x198] sm:$0xff]  ;;  %v421_v51 = vpack.c.bf16 %v249_v36, %v248_v35  ;;  %v214_v53 = vmax.f32 %v22_v38, 0.0  ;;  %v215_v54 = vmax.f32 %v23_v39, 0.0  ;;  %v20_v55 = vld [vmem:[%s4235_s0 + $0x10] sm:$0xff]  ;;  %v34_v2 = vld [vmem:[%s4235_s0 + $0x80] sm:$0xff] }
  0x13   :  { %v412_v52 = vpack.c.bf16 %v231_v42, %v230_v37  ;;  %v21_v56 = vld [vmem:[%s4235_s0 + $0x18] sm:$0xff]  ;;  %v246_v57 = vmax.f32 %v54_v40, 0.0  ;;  %v247_v58 = vmax.f32 %v55_v44, 0.0  ;;  %v228_v59 = vmax.f32 %v36_v45, 0.0  ;;  %v52_v61 = vld [vmem:[%s4235_s0 + $0x110] sm:$0xff]  ;;  %v35_v3 = vld [vmem:[%s4235_s0 + $0x88] sm:$0xff] }
  0x14   :  { %2260 = vmatpush3.bf16.msra.mxu0 %v406_v22  ;;  %v229_v60 = vmax.f32 %v37_v46, 0.0  ;;  %v53_v62 = vld [vmem:[%s4235_s0 + $0x118] sm:$0xff]  ;;  %v428_v63 = vpack.c.bf16 %v263_v48, %v262_v43  ;;  %v260_v0 = vmax.f32 %v68_v49, 0.0  ;;  %v261_v1 = vmax.f32 %v69_v50, 0.0  ;;  %v66_v4 = vld [vmem:[%s4235_s0 + $0x180] sm:$0xff]  ;;  %v67_v7 = vld [vmem:[%s4235_s0 + $0x188] sm:$0xff] }
  0x15   :  { %2324 = vmatpush3.bf16.msra.mxu1 %v422_v28  ;;  %2261 = vmatprep.subr.bf16.mxu0 %v413_v34  ;;  %v212_v5 = vmax.f32 %v20_v55, 0.0  ;;  %v213_v6 = vmax.f32 %v21_v56, 0.0  ;;  %v404_v8 = vpack.c.bf16 %v215_v54, %v214_v53  ;;  %v244_v9 = vmax.f32 %v52_v61, 0.0  ;;  %v18_v11 = vld [vmem:[%s4235_s0] sm:$0xff]  ;;  %v19_v12 = vld [vmem:[%s4235_s0 + $0x8] sm:$0xff]  ;;  %v112_v24 = vld [vmem:[%s4235_s0 + $0x2f0] sm:$0xff] }
  0x16   :  { %2325 = vmatprep.subr.bf16.mxu1 %v429_v41  ;;  %v245_v10 = vmax.f32 %v53_v62, 0.0  ;;  %v2642_v13 = vld [vmem:[%s4236_s1 + $0x4] ss:$48 sps:$4 sm:$0xff]   ;;  %v420_v14 = vpack.c.bf16 %v247_v58, %v246_v57  ;;  %v411_v15 = vpack.c.bf16 %v229_v60, %v228_v59  ;;  %v226_v16 = vmax.f32 %v34_v2, 0.0  ;;  %v51_v22 = vld [vmem:[%s4235_s0 + $0x108] sm:$0xff]  ;;  %v113_v26 = vld [vmem:[%s4235_s0 + $0x2f8] sm:$0xff] }
  0x17   :  { %v227_v17 = vmax.f32 %v35_v3, 0.0  ;;  %v50_v18 = vld [vmem:[%s4235_s0 + $0x100] sm:$0xff]  ;;  %v427_v19 = vpack.c.bf16 %v261_v1, %v260_v0  ;;  %v258_v20 = vmax.f32 %v66_v4, 0.0  ;;  %v259_v21 = vmax.f32 %v67_v7, 0.0  ;;  %1106 = vmatprep.mubr.bf16.mxu0 %v2642_v13  ;;  %v2645_v23 = vld [vmem:[%s4236_s1 + $0xc] ss:$48 sps:$4 sm:$0xff]  }
  0x18   :  { %2262 = vmatpush3.bf16.msra.mxu0 %v405_v47  ;;  %v403_v25 = vpack.c.bf16 %v213_v6, %v212_v5  ;;  %v96_v27 = vld [vmem:[%s4235_s0 + $0x270] sm:$0xff]  ;;  %v419_v28 = vpack.c.bf16 %v245_v10, %v244_v9  ;;  %v210_v29 = vmax.f32 %v18_v11, 0.0  ;;  %v211_v30 = vmax.f32 %v19_v12, 0.0  ;;  %1203 = vmatprep.mubr.bf16.mxu1 %v2645_v23  ;;  %v97_v32 = vld [vmem:[%s4235_s0 + $0x278] sm:$0xff]  ;;  %v110_v47 = vld [vmem:[%s4235_s0 + $0x2e0] sm:$0xff] }
  0x19   :  { %2326 = vmatpush3.bf16.msra.mxu1 %v421_v51  ;;  %2263 = vmatprep.subr.bf16.mxu0 %v412_v52  ;;  %v242_v31 = vmax.f32 %v50_v18, 0.0  ;;  %v144_v33 = vld [vmem:[%s4235_s0 + $0x3f0] sm:$0xff]  ;;  %v145_v34 = vld [vmem:[%s4235_s0 + $0x3f8] sm:$0xff]  ;;  %v410_v35 = vpack.c.bf16 %v227_v17, %v226_v16  ;;  %v243_v36 = vmax.f32 %v51_v22, 0.0  ;;  %v304_v37 = vmax.f32 %v112_v24, 0.0  ;;  %v111_v48 = vld [vmem:[%s4235_s0 + $0x2e8] sm:$0xff] }
  0x1a   :  { %2327 = vmatprep.subr.bf16.mxu1 %v428_v63  ;;  %v305_v38 = vmax.f32 %v113_v26, 0.0  ;;  %v128_v39 = vld [vmem:[%s4235_s0 + $0x370] sm:$0xff]  ;;  %v426_v40 = vpack.c.bf16 %v259_v21, %v258_v20  ;;  %v336_v41 = vmax.f32 %v144_v33, 0.0  ;;  %v337_v42 = vmax.f32 %v145_v34, 0.0  ;;  %v129_v43 = vld [vmem:[%s4235_s0 + $0x378] sm:$0xff]  ;;  %v94_v49 = vld [vmem:[%s4235_s0 + $0x260] sm:$0xff] }
  0x1b   :  { %v402_v44 = vpack.c.bf16 %v211_v30, %v210_v29  ;;  %v288_v45 = vmax.f32 %v96_v27, 0.0  ;;  %v289_v46 = vmax.f32 %v97_v32, 0.0  ;;  %v418_v50 = vpack.c.bf16 %v243_v36, %v242_v31  ;;  %v2640_v51 = vld [vmem:[%s4236_s1] ss:$48 sps:$4 sm:$0xff]   ;;  %v95_v55 = vld [vmem:[%s4235_s0 + $0x268] sm:$0xff]  ;;  %v109_v11 = vld [vmem:[%s4235_s0 + $0x2d8] sm:$0xff] }
  0x1c   :  { %2264 = vmatpush3.bf16.msra.mxu0 %v404_v8  ;;  %v449_v52 = vpack.c.bf16 %v305_v38, %v304_v37  ;;  %v320_v53 = vmax.f32 %v128_v39, 0.0  ;;  %v321_v54 = vmax.f32 %v129_v43, 0.0  ;;  %v142_v56 = vld [vmem:[%s4235_s0 + $0x3e0] sm:$0xff]  ;;  %v143_v57 = vld [vmem:[%s4235_s0 + $0x3e8] sm:$0xff]  ;;  %v465_v58 = vpack.c.bf16 %v337_v42, %v336_v41  ;;  %v108_v10 = vld [vmem:[%s4235_s0 + $0x2d0] sm:$0xff] }
  0x1d   :  { %2328 = vmatpush3.bf16.msra.mxu1 %v420_v14  ;;  %2265 = vmatprep.subr.bf16.mxu0 %v411_v15  ;;  %v302_v59 = vmax.f32 %v110_v47, 0.0  ;;  %v303_v60 = vmax.f32 %v111_v48, 0.0  ;;  %v126_v61 = vld [vmem:[%s4235_s0 + $0x360] sm:$0xff]  ;;  %v127_v62 = vld [vmem:[%s4235_s0 + $0x368] sm:$0xff]  ;;  %v334_v0 = vmax.f32 %v142_v56, 0.0  ;;  %v335_v1 = vmax.f32 %v143_v57, 0.0 }
  0x1e   :  { %2329 = vmatprep.subr.bf16.mxu1 %v427_v19  ;;  %v2643_v63 = vld [vmem:[%s4236_s1 + $0x8] ss:$48 sps:$4 sm:$0xff]   ;;  %v441_v2 = vpack.c.bf16 %v289_v46, %v288_v45  ;;  %v2646_v3 = vld [vmem:[%s4236_s1 + $0x64] ss:$48 sps:$4 sm:$0xff]   ;;  %v286_v4 = vmax.f32 %v94_v49, 0.0  ;;  %v287_v5 = vmax.f32 %v95_v55, 0.0  ;;  %v457_v6 = vpack.c.bf16 %v321_v54, %v320_v53 }
  0x1f   :  { %v2648_v7 = vld [vmem:[%s4236_s1 + $0x6c] ss:$48 sps:$4 sm:$0xff]   ;;  %v318_v8 = vmax.f32 %v126_v61, 0.0  ;;  %v319_v9 = vmax.f32 %v127_v62, 0.0  ;;  %v448_v12 = vpack.c.bf16 %v303_v60, %v302_v59  ;;  %v300_v13 = vmax.f32 %v108_v10, 0.0  ;;  %v92_v15 = vld [vmem:[%s4235_s0 + $0x250] sm:$0xff] }
  0x20   :  { %2266 = vmatpush3.bf16.msra.mxu0 %v403_v25  ;;  %v301_v14 = vmax.f32 %v109_v11, 0.0  ;;  %v93_v16 = vld [vmem:[%s4235_s0 + $0x258] sm:$0xff]  ;;  %v140_v17 = vld [vmem:[%s4235_s0 + $0x3d0] sm:$0xff]  ;;  %v464_v18 = vpack.c.bf16 %v335_v1, %v334_v0  ;;  %v440_v23 = vpack.c.bf16 %v287_v5, %v286_v4  ;;  %v107_v37 = vld [vmem:[%s4235_s0 + $0x2c8] sm:$0xff] }
  0x21   :  { %2330 = vmatpush3.bf16.msra.mxu1 %v419_v28  ;;  %2267 = vmatprep.subr.bf16.mxu0 %v410_v35  ;;  %v141_v19 = vld [vmem:[%s4235_s0 + $0x3d8] sm:$0xff]  ;;  %v332_v20 = vmax.f32 %v140_v17, 0.0  ;;  %v124_v21 = vld [vmem:[%s4235_s0 + $0x350] sm:$0xff]  ;;  %v456_v26 = vpack.c.bf16 %v319_v9, %v318_v8  ;;  %v284_v28 = vmax.f32 %v92_v15, 0.0  ;;  %v285_v29 = vmax.f32 %v93_v16, 0.0  ;;  %v106_v35 = vld [vmem:[%s4235_s0 + $0x2c0] sm:$0xff] }
  0x22   :  { %2331 = vmatprep.subr.bf16.mxu1 %v426_v40  ;;  %v125_v22 = vld [vmem:[%s4235_s0 + $0x358] sm:$0xff]  ;;  %v333_v24 = vmax.f32 %v141_v19, 0.0  ;;  %v2650_v25 = vld [vmem:[%s4236_s1 + $0x60] ss:$48 sps:$4 sm:$0xff]   ;;  %v447_v27 = vpack.c.bf16 %v301_v14, %v300_v13  ;;  %v2652_v31 = vld [vmem:[%s4236_s1 + $0xc4] ss:$48 sps:$4 sm:$0xff]  }
  0x23   :  { %v2651_v30 = vld [vmem:[%s4236_s1 + $0x68] ss:$48 sps:$4 sm:$0xff]   ;;  %v316_v33 = vmax.f32 %v124_v21, 0.0  ;;  %v317_v34 = vmax.f32 %v125_v22, 0.0  ;;  %v2654_v36 = vld [vmem:[%s4236_s1 + $0xcc] ss:$48 sps:$4 sm:$0xff]   ;;  %v439_v46 = vpack.c.bf16 %v285_v29, %v284_v28 }
  0x24   :  { %2268 = vmatpush3.bf16.msra.mxu0 %v402_v44  ;;  %v463_v32 = vpack.c.bf16 %v333_v24, %v332_v20  ;;  %v298_v38 = vmax.f32 %v106_v35, 0.0  ;;  %v90_v39 = vld [vmem:[%s4235_s0 + $0x240] sm:$0xff]  ;;  %v91_v40 = vld [vmem:[%s4235_s0 + $0x248] sm:$0xff]  ;;  %v299_v41 = vmax.f32 %v107_v37, 0.0  ;;  %v104_v56 = vld [vmem:[%s4235_s0 + $0x2b0] sm:$0xff] }
  0x25   :  { %2332 = vmatpush3.bf16.msra.mxu1 %v418_v50  ;;  %2381 = vmatprep.subr.bf16.mxu0 %v449_v52  ;;  %v282_v42 = vmax.f32 %v90_v39, 0.0  ;;  %v138_v43 = vld [vmem:[%s4235_s0 + $0x3c0] sm:$0xff]  ;;  %v139_v44 = vld [vmem:[%s4235_s0 + $0x3c8] sm:$0xff]  ;;  %v283_v47 = vmax.f32 %v91_v40, 0.0  ;;  %v105_v57 = vld [vmem:[%s4235_s0 + $0x2b8] sm:$0xff]  ;;  %v296_v60 = vmax.f32 %v104_v56, 0.0 }
  0x26   :  { %2445 = vmatprep.subr.bf16.mxu1 %v465_v58  ;;  %v122_v45 = vld [vmem:[%s4235_s0 + $0x340] sm:$0xff]  ;;  %v330_v48 = vmax.f32 %v138_v43, 0.0  ;;  %v331_v49 = vmax.f32 %v139_v44, 0.0  ;;  %v123_v50 = vld [vmem:[%s4235_s0 + $0x348] sm:$0xff]  ;;  %v446_v52 = vpack.c.bf16 %v299_v41, %v298_v38  ;;  %v88_v58 = vld [vmem:[%s4235_s0 + $0x230] sm:$0xff]  ;;  %v297_v61 = vmax.f32 %v105_v57, 0.0 }
  0x27   :  { %1107 = vmatmul.mubr.bf16.vlgmr.msra.gmra.mxu0 %v2640_v51  ;;  %v455_v51 = vpack.c.bf16 %v317_v34, %v316_v33  ;;  %v314_v53 = vmax.f32 %v122_v45, 0.0  ;;  %v315_v54 = vmax.f32 %v123_v50, 0.0  ;;  %v438_v59 = vpack.c.bf16 %v283_v47, %v282_v42  ;;  %v89_v62 = vld [vmem:[%s4235_s0 + $0x238] sm:$0xff]  ;;  %v136_v0 = vld [vmem:[%s4235_s0 + $0x3b0] sm:$0xff]  ;;  %v102_v17 = vld [vmem:[%s4235_s0 + $0x2a0] sm:$0xff] }
  0x28   :  { %1204 = vmatmul.mubr.bf16.vlgmr.msra.gmra.mxu1 %v2643_v63  ;;  %2382 = vmatpush3.bf16.msra.mxu0 %v441_v2  ;;  %v462_v55 = vpack.c.bf16 %v331_v49, %v330_v48  ;;  %v280_v63 = vmax.f32 %v88_v58, 0.0  ;;  %v137_v1 = vld [vmem:[%s4235_s0 + $0x3b8] sm:$0xff]  ;;  %v328_v4 = vmax.f32 %v136_v0, 0.0  ;;  %v2656_v8 = vld [vmem:[%s4236_s1 + $0xc0] ss:$48 sps:$4 sm:$0xff]   ;;  %v445_v9 = vpack.c.bf16 %v297_v61, %v296_v60 }
  0x29   :  { %2446 = vmatpush3.bf16.msra.mxu1 %v457_v6  ;;  %1114 = vmatprep.mubr.bf16.mxu0 %v2646_v3  ;;  %v454_v2 = vpack.c.bf16 %v315_v54, %v314_v53  ;;  %v281_v3 = vmax.f32 %v89_v62, 0.0  ;;  %v329_v5 = vmax.f32 %v137_v1, 0.0  ;;  %v120_v6 = vld [vmem:[%s4235_s0 + $0x330] sm:$0xff]  ;;  %v2660_v15 = vld [vmem:[%s4236_s1 + $0x12c] ss:$48 sps:$4 sm:$0xff]   ;;  %v294_v20 = vmax.f32 %v102_v17, 0.0 }
  0x2a   :  { %1211 = vmatprep.mubr.bf16.mxu1 %v2648_v7  ;;  %2383 = vmatprep.subr.bf16.mxu0 %v448_v12  ;;  %v121_v7 = vld [vmem:[%s4235_s0 + $0x338] sm:$0xff]  ;;  %v312_v10 = vmax.f32 %v120_v6, 0.0  ;;  %v2658_v13 = vld [vmem:[%s4236_s1 + $0x124] ss:$48 sps:$4 sm:$0xff]   ;;  %v2662_v35 = vld [vmem:[%s4236_s1 + $0x120] ss:$48 sps:$4 sm:$0xff]  }
  0x2b   :  { %2447 = vmatprep.subr.bf16.mxu1 %v464_v18  ;;  %v313_v11 = vmax.f32 %v121_v7, 0.0  ;;  %v2657_v12 = vld [vmem:[%s4236_s1 + $0xc8] ss:$48 sps:$4 sm:$0xff]   ;;  %v461_v14 = vpack.c.bf16 %v329_v5, %v328_v4  ;;  %v437_v16 = vpack.c.bf16 %v281_v3, %v280_v63  ;;  %v86_v22 = vld [vmem:[%s4235_s0 + $0x220] sm:$0xff]  ;;  %v100_v41 = vld [vmem:[%s4235_s0 + $0x290] sm:$0xff] }
  0x2c   :  { %2384 = vmatpush3.bf16.msra.mxu0 %v440_v23  ;;  %v103_v18 = vld [vmem:[%s4235_s0 + $0x2a8] sm:$0xff]  ;;  %v134_v24 = vld [vmem:[%s4235_s0 + $0x3a0] sm:$0xff]  ;;  %v101_v43 = vld [vmem:[%s4235_s0 + $0x298] sm:$0xff]  ;;  %v292_v44 = vmax.f32 %v100_v41, 0.0 }
  0x2d   :  { %2448 = vmatpush3.bf16.msra.mxu1 %v456_v26  ;;  %2385 = vmatprep.subr.bf16.mxu0 %v447_v27  ;;  %v453_v19 = vpack.c.bf16 %v313_v11, %v312_v10  ;;  %v295_v21 = vmax.f32 %v103_v18, 0.0  ;;  %v87_v23 = vld [vmem:[%s4235_s0 + $0x228] sm:$0xff]  ;;  %v326_v28 = vmax.f32 %v134_v24, 0.0  ;;  %v118_v29 = vld [vmem:[%s4235_s0 + $0x320] sm:$0xff]  ;;  %v84_v45 = vld [vmem:[%s4235_s0 + $0x210] sm:$0xff]  ;;  %v293_v47 = vmax.f32 %v101_v43, 0.0 }
  0x2e   :  { %2449 = vmatprep.subr.bf16.mxu1 %v463_v32  ;;  %v279_v26 = vmax.f32 %v87_v23, 0.0  ;;  %v135_v27 = vld [vmem:[%s4235_s0 + $0x3a8] sm:$0xff]  ;;  %v310_v33 = vmax.f32 %v118_v29, 0.0  ;;  %v2664_v38 = vld [vmem:[%s4236_s1 + $0x184] ss:$48 sps:$4 sm:$0xff]   ;;  %v276_v48 = vmax.f32 %v84_v45, 0.0 }
  0x2f   :  { %1115 = vmatmul.mubr.bf16.gmra.mxu0 %v2650_v25  ;;  %v278_v25 = vmax.f32 %v86_v22, 0.0  ;;  %v327_v32 = vmax.f32 %v135_v27, 0.0  ;;  %v2663_v37 = vld [vmem:[%s4236_s1 + $0x128] ss:$48 sps:$4 sm:$0xff]   ;;  %v2666_v42 = vld [vmem:[%s4236_s1 + $0x18c] ss:$48 sps:$4 sm:$0xff]   ;;  %v443_v57 = vpack.c.bf16 %v293_v47, %v292_v44 }
  0x30   :  { %1212 = vmatmul.mubr.bf16.gmra.mxu1 %v2651_v30  ;;  %1122 = vmatprep.mubr.bf16.mxu0 %v2652_v31  ;;  %v119_v30 = vld [vmem:[%s4235_s0 + $0x328] sm:$0xff]  ;;  %v444_v31 = vpack.c.bf16 %v295_v21, %v294_v20  ;;  %v132_v50 = vld [vmem:[%s4235_s0 + $0x390] sm:$0xff]  ;;  %v98_v62 = vld [vmem:[%s4235_s0 + $0x280] sm:$0xff] }
  0x31   :  { %1219 = vmatprep.mubr.bf16.mxu1 %v2654_v36  ;;  %2386 = vmatpush3.bf16.msra.mxu0 %v439_v46  ;;  %v311_v34 = vmax.f32 %v119_v30, 0.0  ;;  %v436_v36 = vpack.c.bf16 %v279_v26, %v278_v25  ;;  %v460_v39 = vpack.c.bf16 %v327_v32, %v326_v28  ;;  %v85_v46 = vld [vmem:[%s4235_s0 + $0x218] sm:$0xff]  ;;  %v324_v53 = vmax.f32 %v132_v50, 0.0  ;;  %v99_v63 = vld [vmem:[%s4235_s0 + $0x288] sm:$0xff]  ;;  %v82_v0 = vld [vmem:[%s4235_s0 + $0x200] sm:$0xff] }
  0x32   :  { %2450 = vmatpush3.bf16.msra.mxu1 %v455_v51  ;;  %2387 = vmatprep.subr.bf16.mxu0 %v446_v52  ;;  %v277_v49 = vmax.f32 %v85_v46, 0.0  ;;  %v133_v51 = vld [vmem:[%s4235_s0 + $0x398] sm:$0xff]  ;;  %v116_v52 = vld [vmem:[%s4235_s0 + $0x310] sm:$0xff]  ;;  %v290_v1 = vmax.f32 %v98_v62, 0.0  ;;  %v83_v3 = vld [vmem:[%s4235_s0 + $0x208] sm:$0xff]  ;;  %v274_v4 = vmax.f32 %v82_v0, 0.0 }
  0x33   :  { %2451 = vmatprep.subr.bf16.mxu1 %v462_v55  ;;  %v452_v40 = vpack.c.bf16 %v311_v34, %v310_v33  ;;  %v325_v54 = vmax.f32 %v133_v51, 0.0  ;;  %v117_v55 = vld [vmem:[%s4235_s0 + $0x318] sm:$0xff]  ;;  %v308_v56 = vmax.f32 %v116_v52, 0.0  ;;  %v130_v5 = vld [vmem:[%s4235_s0 + $0x380] sm:$0xff]  ;;  %v131_v6 = vld [vmem:[%s4235_s0 + $0x388] sm:$0xff]  ;;  %v275_v7 = vmax.f32 %v83_v3, 0.0 }
  0x34   :  { %v435_v58 = vpack.c.bf16 %v277_v49, %v276_v48  ;;  %v114_v10 = vld [vmem:[%s4235_s0 + $0x300] sm:$0xff]  ;;  %v115_v11 = vld [vmem:[%s4235_s0 + $0x308] sm:$0xff]  ;;  %v176_v22 = vld [vmem:[%s4235_s0 + $0x4f0] sm:$0xff] }
  0x35   :  { %2388 = vmatpush3.bf16.msra.mxu0 %v438_v59  ;;  %v309_v59 = vmax.f32 %v117_v55, 0.0  ;;  %v459_v60 = vpack.c.bf16 %v325_v54, %v324_v53  ;;  %v2670_v17 = vld [vmem:[%s4236_s1 + $0x1e4] ss:$48 sps:$4 sm:$0xff]   ;;  %v434_v18 = vpack.c.bf16 %v275_v7, %v274_v4  ;;  %v2672_v20 = vld [vmem:[%s4236_s1 + $0x1ec] ss:$48 sps:$4 sm:$0xff]   ;;  %v368_v24 = vmax.f32 %v176_v22, 0.0 }
  0x36   :  { %2452 = vmatpush3.bf16.msra.mxu1 %v454_v2  ;;  %2389 = vmatprep.subr.bf16.mxu0 %v445_v9  ;;  %v291_v2 = vmax.f32 %v99_v63, 0.0  ;;  %v323_v9 = vmax.f32 %v131_v6, 0.0  ;;  %v177_v23 = vld [vmem:[%s4235_s0 + $0x4f8] sm:$0xff]  ;;  %v208_v26 = vld [vmem:[%s4235_s0 + $0x5f0] sm:$0xff]  ;;  %v174_v50 = vld [vmem:[%s4235_s0 + $0x4e0] sm:$0xff] }
  0x37   :  { %1123 = vmatmul.mubr.bf16.gmra.mxu0 %v2656_v8  ;;  %2453 = vmatprep.subr.bf16.mxu1 %v461_v14  ;;  %v451_v61 = vpack.c.bf16 %v309_v59, %v308_v56  ;;  %v322_v8 = vmax.f32 %v130_v5, 0.0  ;;  %v306_v14 = vmax.f32 %v114_v10, 0.0  ;;  %v369_v25 = vmax.f32 %v177_v23, 0.0  ;;  %v209_v27 = vld [vmem:[%s4235_s0 + $0x5f8] sm:$0xff]  ;;  %v2674_v32 = vld [vmem:[%s4236_s1 + $0x1e0] ss:$48 sps:$4 sm:$0xff]  }
  0x38   :  { %1220 = vmatmul.mubr.bf16.gmra.mxu1 %v2657_v12  ;;  %1130 = vmatprep.mubr.bf16.mxu0 %v2658_v13  ;;  %v2668_v12 = vld [vmem:[%s4236_s1 + $0x180] ss:$48 sps:$4 sm:$0xff]   ;;  %v442_v13 = vpack.c.bf16 %v291_v2, %v290_v1  ;;  %v400_v28 = vmax.f32 %v208_v26, 0.0  ;;  %v401_v30 = vmax.f32 %v209_v27, 0.0  ;;  %v2675_v33 = vld [vmem:[%s4236_s1 + $0x1e8] ss:$48 sps:$4 sm:$0xff]  }
  0x39   :  { %1227 = vmatprep.mubr.bf16.mxu1 %v2660_v15  ;;  %2390 = vmatpush3.bf16.msra.mxu0 %v437_v16  ;;  %v307_v15 = vmax.f32 %v115_v11, 0.0  ;;  %v2669_v16 = vld [vmem:[%s4236_s1 + $0x188] ss:$48 sps:$4 sm:$0xff]   ;;  %v481_v29 = vpack.c.bf16 %v369_v25, %v368_v24  ;;  %v2676_v34 = vld [vmem:[%s4236_s1 + $0x244] ss:$48 sps:$4 sm:$0xff]   ;;  %v366_v63 = vmax.f32 %v174_v50, 0.0 }
  0x3a   :  { %2454 = vmatpush3.bf16.msra.mxu1 %v453_v19  ;;  %2391 = vmatprep.subr.bf16.mxu0 %v444_v31  ;;  %v458_v19 = vpack.c.bf16 %v323_v9, %v322_v8  ;;  %v497_v31 = vpack.c.bf16 %v401_v30, %v400_v28  ;;  %v2687_v41 = vld [vmem:[%s4236_s1 + $0x2a8] ss:$48 sps:$4 sm:$0xff]   ;;  %v2693_v43 = vld [vmem:[%s4236_s1 + $0x1c] ss:$48 sps:$4 sm:$0xff]   ;;  %v160_v44 = vld [vmem:[%s4235_s0 + $0x470] sm:$0xff] }
  0x3b   :  { %2455 = vmatprep.subr.bf16.mxu1 %v460_v39  ;;  %v450_v21 = vpack.c.bf16 %v307_v15, %v306_v14  ;;  %v2684_v39 = vld [vmem:[%s4236_s1 + $0x2ac] ss:$48 sps:$4 sm:$0xff]   ;;  %v192_v46 = vld [vmem:[%s4235_s0 + $0x570] sm:$0xff]  ;;  %v352_v48 = vmax.f32 %v160_v44, 0.0  ;;  %v158_v52 = vld [vmem:[%s4235_s0 + $0x460] sm:$0xff] }
  0x3c   :  { %v161_v45 = vld [vmem:[%s4235_s0 + $0x478] sm:$0xff]  ;;  %v175_v51 = vld [vmem:[%s4235_s0 + $0x4e8] sm:$0xff]  ;;  %v206_v54 = vld [vmem:[%s4235_s0 + $0x5e0] sm:$0xff]  ;;  %v350_v8 = vmax.f32 %v158_v52, 0.0 }
  0x3d   :  { %2392 = vmatpush3.bf16.msra.mxu0 %v436_v36  ;;  %v2680_v36 = vld [vmem:[%s4236_s1 + $0x240] ss:$48 sps:$4 sm:$0xff]   ;;  %v193_v47 = vld [vmem:[%s4235_s0 + $0x578] sm:$0xff]  ;;  %v353_v49 = vmax.f32 %v161_v45, 0.0  ;;  %v159_v53 = vld [vmem:[%s4235_s0 + $0x468] sm:$0xff]  ;;  %v367_v0 = vmax.f32 %v175_v51, 0.0 }
  0x3e   :  { %2456 = vmatpush3.bf16.msra.mxu1 %v452_v40  ;;  %2393 = vmatprep.subr.bf16.mxu0 %v443_v57  ;;  %v2686_v40 = vld [vmem:[%s4236_s1 + $0x2a0] ss:$48 sps:$4 sm:$0xff]   ;;  %v207_v55 = vld [vmem:[%s4235_s0 + $0x5e8] sm:$0xff]  ;;  %v384_v57 = vmax.f32 %v192_v46, 0.0  ;;  %v173_v1 = vld [vmem:[%s4235_s0 + $0x4d8] sm:$0xff]  ;;  %v398_v5 = vmax.f32 %v206_v54, 0.0 }
  0x3f   :  { %1131 = vmatmul.mubr.bf16.gmra.mxu0 %v2662_v35  ;;  %2457 = vmatprep.subr.bf16.mxu1 %v459_v60  ;;  %v2678_v35 = vld [vmem:[%s4236_s1 + $0x24c] ss:$48 sps:$4 sm:$0xff]   ;;  %v2688_v56 = vld [vmem:[%s4236_s1 + $0x10] ss:$48 sps:$4 sm:$0xff]   ;;  %v2691_v62 = vld [vmem:[%s4236_s1 + $0x18] ss:$48 sps:$4 sm:$0xff]   ;;  %v473_v3 = vpack.c.bf16 %v353_v49, %v352_v48 }
  0x40   :  { %1228 = vmatmul.mubr.bf16.gmra.mxu1 %v2663_v37  ;;  %1138 = vmatprep.mubr.bf16.mxu0 %v2664_v38  ;;  %v2681_v37 = vld [vmem:[%s4236_s1 + $0x248] ss:$48 sps:$4 sm:$0xff]   ;;  %v2682_v38 = vld [vmem:[%s4236_s1 + $0x2a4] ss:$48 sps:$4 sm:$0xff]   ;;  %v399_v6 = vmax.f32 %v207_v55, 0.0  ;;  %v351_v9 = vmax.f32 %v159_v53, 0.0 }
  0x41   :  { %1235 = vmatprep.mubr.bf16.mxu1 %v2666_v42  ;;  %2394 = vmatpush3.bf16.msra.mxu0 %v435_v58  ;;  %v2690_v42 = vld [vmem:[%s4236_s1 + $0x14] ss:$48 sps:$4 sm:$0xff]   ;;  %v385_v58 = vmax.f32 %v193_v47, 0.0  ;;  %v191_v60 = vld [vmem:[%s4235_s0 + $0x568] sm:$0xff]  ;;  %v205_v7 = vld [vmem:[%s4235_s0 + $0x5d8] sm:$0xff]  ;;  %v365_v15 = vmax.f32 %v173_v1, 0.0 }
  0x42   :  { %2458 = vmatpush3.bf16.msra.mxu1 %v451_v61  ;;  %2395 = vmatprep.subr.bf16.mxu0 %v442_v13  ;;  %v190_v59 = vld [vmem:[%s4235_s0 + $0x560] sm:$0xff]  ;;  %v172_v61 = vld [vmem:[%s4235_s0 + $0x4d0] sm:$0xff]  ;;  %v383_v11 = vmax.f32 %v191_v60, 0.0  ;;  %v2696_v13 = vld [vmem:[%s4236_s1 + $0x7c] ss:$48 sps:$4 sm:$0xff]   ;;  %v496_v24 = vpack.c.bf16 %v399_v6, %v398_v5  ;;  %v472_v28 = vpack.c.bf16 %v351_v9, %v350_v8 }
  0x43   :  { %2459 = vmatprep.subr.bf16.mxu1 %v458_v19  ;;  %v204_v2 = vld [vmem:[%s4235_s0 + $0x5d0] sm:$0xff]  ;;  %v382_v10 = vmax.f32 %v190_v59, 0.0  ;;  %v364_v14 = vmax.f32 %v172_v61, 0.0  ;;  %v189_v22 = vld [vmem:[%s4235_s0 + $0x558] sm:$0xff]  ;;  %v170_v23 = vld [vmem:[%s4235_s0 + $0x4c0] sm:$0xff] }
  0x44   :  { %v2694_v4 = vld [vmem:[%s4236_s1 + $0x74] ss:$48 sps:$4 sm:$0xff]   ;;  %v396_v19 = vmax.f32 %v204_v2, 0.0  ;;  %v171_v25 = vld [vmem:[%s4235_s0 + $0x4c8] sm:$0xff]  ;;  %v2698_v30 = vld [vmem:[%s4236_s1 + $0x70] ss:$48 sps:$4 sm:$0xff]  }
  0x45   :  { %2396 = vmatpush3.bf16.msra.mxu0 %v434_v18  ;;  %v480_v18 = vpack.c.bf16 %v367_v0, %v366_v63  ;;  %v202_v26 = vld [vmem:[%s4235_s0 + $0x5c0] sm:$0xff]  ;;  %v203_v27 = vld [vmem:[%s4235_s0 + $0x5c8] sm:$0xff]  ;;  %v168_v48 = vld [vmem:[%s4235_s0 + $0x4b0] sm:$0xff] }
  0x46   :  { %2460 = vmatpush3.bf16.msra.mxu1 %v450_v21  ;;  %2509 = vmatprep.subr.bf16.mxu0 %v481_v29  ;;  %v188_v21 = vld [vmem:[%s4235_s0 + $0x550] sm:$0xff]  ;;  %v488_v29 = vpack.c.bf16 %v383_v11, %v382_v10  ;;  %v187_v44 = vld [vmem:[%s4235_s0 + $0x548] sm:$0xff]  ;;  %v394_v46 = vmax.f32 %v202_v26, 0.0  ;;  %v395_v47 = vmax.f32 %v203_v27, 0.0  ;;  %v169_v49 = vld [vmem:[%s4235_s0 + $0x4b8] sm:$0xff]  ;;  %v360_v63 = vmax.f32 %v168_v48, 0.0 }
  0x47   :  { %1139 = vmatmul.mubr.bf16.gmra.mxu0 %v2668_v12  ;;  %2573 = vmatprep.subr.bf16.mxu1 %v497_v31  ;;  %v489_v12 = vpack.c.bf16 %v385_v58, %v384_v57  ;;  %v479_v31 = vpack.c.bf16 %v365_v15, %v364_v14  ;;  %v2702_v45 = vld [vmem:[%s4236_s1 + $0xdc] ss:$48 sps:$4 sm:$0xff]   ;;  %v152_v52 = vld [vmem:[%s4235_s0 + $0x430] sm:$0xff]  ;;  %v379_v59 = vmax.f32 %v187_v44, 0.0  ;;  %v361_v0 = vmax.f32 %v169_v49, 0.0  ;;  %v166_v1 = vld [vmem:[%s4235_s0 + $0x4a0] sm:$0xff] }
  0x48   :  { %1236 = vmatmul.mubr.bf16.gmra.mxu1 %v2669_v16  ;;  %1146 = vmatprep.mubr.bf16.mxu0 %v2670_v17  ;;  %v156_v16 = vld [vmem:[%s4235_s0 + $0x450] sm:$0xff]  ;;  %v157_v17 = vld [vmem:[%s4235_s0 + $0x458] sm:$0xff]  ;;  %v167_v2 = vld [vmem:[%s4235_s0 + $0x4a8] sm:$0xff] }
  0x49   :  { %1243 = vmatprep.mubr.bf16.mxu1 %v2672_v20  ;;  %v397_v20 = vmax.f32 %v205_v7, 0.0  ;;  %v153_v53 = vld [vmem:[%s4235_s0 + $0x438] sm:$0xff]  ;;  %v200_v54 = vld [vmem:[%s4235_s0 + $0x5b0] sm:$0xff]  ;;  %v150_v6 = vld [vmem:[%s4235_s0 + $0x420] sm:$0xff] }
  0x4a   :  { %v201_v55 = vld [vmem:[%s4235_s0 + $0x5b8] sm:$0xff]  ;;  %v151_v7 = vld [vmem:[%s4235_s0 + $0x428] sm:$0xff]  ;;  %v198_v8 = vld [vmem:[%s4235_s0 + $0x5a0] sm:$0xff]  ;;  %v345_v14 = vmax.f32 %v153_v53, 0.0 }
  0x4b   :  { %v185_v60 = vld [vmem:[%s4235_s0 + $0x538] sm:$0xff]  ;;  %v393_v5 = vmax.f32 %v201_v55, 0.0  ;;  %v199_v10 = vld [vmem:[%s4235_s0 + $0x5a8] sm:$0xff]  ;;  %v2704_v11 = vld [vmem:[%s4236_s1 + $0xd0] ss:$48 sps:$4 sm:$0xff]   ;;  %v390_v27 = vmax.f32 %v198_v8, 0.0 }
  0x4c   :  { %v181_v44 = vld [vmem:[%s4235_s0 + $0x518] sm:$0xff]  ;;  %v163_v49 = vld [vmem:[%s4235_s0 + $0x488] sm:$0xff]  ;;  %v2710_v53 = vld [vmem:[%s4236_s1 + $0x130] ss:$48 sps:$4 sm:$0xff]  }
  0x4f   :  { %1147 = vmatmul.mubr.bf16.gmra.mxu0 %v2674_v32  ;;  %v348_v32 = vmax.f32 %v156_v16, 0.0  ;;  %v182_v16 = vld [vmem:[%s4235_s0 + $0x520] sm:$0xff] }
  0x50   :  { %1244 = vmatmul.mubr.bf16.gmra.mxu1 %v2675_v33  ;;  %1154 = vmatprep.mubr.bf16.mxu0 %v2676_v34  ;;  %v349_v33 = vmax.f32 %v157_v17, 0.0  ;;  %v380_v34 = vmax.f32 %v188_v21, 0.0  ;;  %v2705_v17 = vld [vmem:[%s4236_s1 + $0xd8] ss:$48 sps:$4 sm:$0xff]   ;;  %v358_v21 = vmax.f32 %v166_v1, 0.0 }
  0x51   :  { %1251 = vmatprep.mubr.bf16.mxu1 %v2678_v35  ;;  %v154_v35 = vld [vmem:[%s4235_s0 + $0x440] sm:$0xff] }
  0x52   :  { %v346_v50 = vmax.f32 %v154_v35, 0.0  ;;  %v471_v57 = vpack.c.bf16 %v349_v33, %v348_v32  ;;  %v343_v32 = vmax.f32 %v151_v7, 0.0  ;;  %v148_v33 = vld [vmem:[%s4235_s0 + $0x410] sm:$0xff]  ;;  %v197_v35 = vld [vmem:[%s4235_s0 + $0x598] sm:$0xff] }
  0x53   :  { %v389_v48 = vmax.f32 %v197_v35, 0.0  ;;  %v340_v55 = vmax.f32 %v148_v33, 0.0  ;;  %v2714_v7 = vld [vmem:[%s4236_s1 + $0x19c] ss:$48 sps:$4 sm:$0xff]   ;;  %v2739_v35 = vld [vmem:[%s4236_s1 + $0x28] ss:$48 sps:$4 sm:$0xff]  }
  0x54   :  { %v2741_v33 = vld [vmem:[%s4236_s1 + $0x2c] ss:$48 sps:$4 sm:$0xff]  }
  0x57   :  { %1155 = vmatmul.mubr.bf16.gmra.mxu0 %v2680_v36  ;;  %v155_v36 = vld [vmem:[%s4235_s0 + $0x448] sm:$0xff] }
  0x58   :  { %1252 = vmatmul.mubr.bf16.gmra.mxu1 %v2681_v37  ;;  %1162 = vmatprep.mubr.bf16.mxu0 %v2682_v38  ;;  %v2699_v37 = vld [vmem:[%s4236_s1 + $0x78] ss:$48 sps:$4 sm:$0xff]   ;;  %v2700_v38 = vld [vmem:[%s4236_s1 + $0xd4] ss:$48 sps:$4 sm:$0xff]   ;;  %v347_v51 = vmax.f32 %v155_v36, 0.0 }
  0x59   :  { %1259 = vmatprep.mubr.bf16.mxu1 %v2684_v39  ;;  %v495_v39 = vpack.c.bf16 %v397_v20, %v396_v19  ;;  %v477_v19 = vpack.c.bf16 %v361_v0, %v360_v63  ;;  %v377_v20 = vmax.f32 %v185_v60, 0.0  ;;  %v373_v60 = vmax.f32 %v181_v44, 0.0  ;;  %v146_v63 = vld [vmem:[%s4235_s0 + $0x400] sm:$0xff]  ;;  %v147_v0 = vld [vmem:[%s4235_s0 + $0x408] sm:$0xff] }
  0x5a   :  { %v470_v9 = vpack.c.bf16 %v347_v51, %v346_v50  ;;  %v194_v50 = vld [vmem:[%s4235_s0 + $0x580] sm:$0xff] }
  0x5b   :  { %v2754_v44 = vld [vmem:[%s4236_s1 + $0x144] ss:$48 sps:$4 sm:$0xff]  }
  0x5f   :  { %1163 = vmatmul.mubr.bf16.gmra.mxu0 %v2686_v40  ;;  %v381_v40 = vmax.f32 %v189_v22, 0.0  ;;  %v359_v22 = vmax.f32 %v167_v2, 0.0  ;;  %v386_v2 = vmax.f32 %v194_v50, 0.0  ;;  %v2762_v50 = vld [vmem:[%s4236_s1 + $0x1a0] ss:$48 sps:$4 sm:$0xff]  }
  0x60   :  { %1260 = vmatmul.mubr.bf16.gmra.mxu1 %v2687_v41  ;;  %1300 = vmatprep.mubr.bf16.mxu0 %v2690_v42  ;;  %v362_v41 = vmax.f32 %v170_v23, 0.0  ;;  %v363_v42 = vmax.f32 %v171_v25, 0.0  ;;  %v183_v23 = vld [vmem:[%s4235_s0 + $0x528] sm:$0xff] }
  0x61   :  { %1397 = vmatprep.mubr.bf16.mxu1 %v2693_v43  ;;  %v186_v43 = vld [vmem:[%s4235_s0 + $0x540] sm:$0xff]  ;;  %v487_v61 = vpack.c.bf16 %v381_v40, %v380_v34  ;;  %v2708_v25 = vld [vmem:[%s4236_s1 + $0x13c] ss:$48 sps:$4 sm:$0xff]  }
  0x62   :  { %v378_v58 = vmax.f32 %v186_v43, 0.0  ;;  %v149_v34 = vld [vmem:[%s4235_s0 + $0x418] sm:$0xff] }
  0x67   :  { %1301 = vmatmul.mubr.bf16.vlgmr.msra.gmra.mxu0 %v2688_v56  ;;  %v3469_v56 = vld [vmem:[%s4235_s0 + $0x530] sm:$0xff] }
  0x68   :  { %1398 = vmatmul.mubr.bf16.vlgmr.msra.gmra.mxu1 %v2691_v62  ;;  %2510 = vmatpush3.bf16.msra.mxu0 %v473_v3  ;;  %v478_v62 = vpack.c.bf16 %v363_v42, %v362_v41  ;;  %v494_v3 = vpack.c.bf16 %v395_v47, %v394_v46  ;;  %v376_v15 = vmax.f32 %v3469_v56, 0.0  ;;  %v476_v41 = vpack.c.bf16 %v359_v22, %v358_v21  ;;  %v2720_v21 = vld [vmem:[%s4236_s1 + $0x1fc] ss:$48 sps:$4 sm:$0xff]   ;;  %v2722_v22 = vld [vmem:[%s4236_s1 + $0x1f0] ss:$48 sps:$4 sm:$0xff]  }
  0x69   :  { %2574 = vmatpush3.bf16.msra.mxu1 %v489_v12  ;;  %1308 = vmatprep.mubr.bf16.mxu0 %v2694_v4  ;;  %v392_v4 = vmax.f32 %v200_v54, 0.0  ;;  %v486_v12 = vpack.c.bf16 %v379_v59, %v378_v58  ;;  %v341_v56 = vmax.f32 %v149_v34, 0.0  ;;  %v2711_v58 = vld [vmem:[%s4236_s1 + $0x138] ss:$48 sps:$4 sm:$0xff]   ;;  %v2736_v34 = vld [vmem:[%s4236_s1 + $0x20] ss:$48 sps:$4 sm:$0xff]  }
  0x6a   :  { %1405 = vmatprep.mubr.bf16.mxu1 %v2696_v13  ;;  %2511 = vmatprep.subr.bf16.mxu0 %v480_v18  ;;  %v344_v13 = vmax.f32 %v152_v52, 0.0  ;;  %v2706_v18 = vld [vmem:[%s4236_s1 + $0x134] ss:$48 sps:$4 sm:$0xff]   ;;  %v485_v40 = vpack.c.bf16 %v377_v20, %v376_v15  ;;  %v195_v52 = vld [vmem:[%s4235_s0 + $0x588] sm:$0xff] }
  0x6b   :  { %2575 = vmatprep.subr.bf16.mxu1 %v496_v24  ;;  %v164_v24 = vld [vmem:[%s4235_s0 + $0x490] sm:$0xff]  ;;  %v493_v26 = vpack.c.bf16 %v393_v5, %v392_v4  ;;  %v178_v4 = vld [vmem:[%s4235_s0 + $0x500] sm:$0xff]  ;;  %v179_v5 = vld [vmem:[%s4235_s0 + $0x508] sm:$0xff]  ;;  %v467_v8 = vpack.c.bf16 %v341_v56, %v340_v55 }
  0x6c   :  { %2512 = vmatpush3.bf16.msra.mxu0 %v472_v28  ;;  %v391_v28 = vmax.f32 %v199_v10, 0.0  ;;  %v469_v36 = vpack.c.bf16 %v345_v14, %v344_v13  ;;  %v356_v42 = vmax.f32 %v164_v24, 0.0  ;;  %v339_v10 = vmax.f32 %v147_v0, 0.0  ;;  %v2718_v20 = vld [vmem:[%s4236_s1 + $0x1f4] ss:$48 sps:$4 sm:$0xff]  }
  0x6d   :  { %2576 = vmatpush3.bf16.msra.mxu1 %v488_v29  ;;  %2513 = vmatprep.subr.bf16.mxu0 %v479_v31  ;;  %v165_v29 = vld [vmem:[%s4235_s0 + $0x498] sm:$0xff]  ;;  %v342_v31 = vmax.f32 %v150_v6, 0.0  ;;  %v2712_v6 = vld [vmem:[%s4236_s1 + $0x194] ss:$48 sps:$4 sm:$0xff]   ;;  %v370_v13 = vmax.f32 %v178_v4, 0.0  ;;  %v371_v14 = vmax.f32 %v179_v5, 0.0 }
  0x6e   :  { %2577 = vmatprep.subr.bf16.mxu1 %v495_v39  ;;  %v180_v39 = vld [vmem:[%s4235_s0 + $0x510] sm:$0xff]  ;;  %v357_v43 = vmax.f32 %v165_v29, 0.0  ;;  %v492_v46 = vpack.c.bf16 %v391_v28, %v390_v27  ;;  %v2729_v27 = vld [vmem:[%s4236_s1 + $0x258] ss:$48 sps:$4 sm:$0xff]   ;;  %v2732_v29 = vld [vmem:[%s4236_s1 + $0x2bc] ss:$48 sps:$4 sm:$0xff]  }
  0x6f   :  { %1309 = vmatmul.mubr.bf16.gmra.mxu0 %v2698_v30  ;;  %v196_v30 = vld [vmem:[%s4235_s0 + $0x590] sm:$0xff]  ;;  %v468_v51 = vpack.c.bf16 %v343_v32, %v342_v31  ;;  %v2735_v31 = vld [vmem:[%s4236_s1 + $0x2b8] ss:$48 sps:$4 sm:$0xff]  }
  0x70   :  { %1406 = vmatmul.mubr.bf16.gmra.mxu1 %v2699_v37  ;;  %1316 = vmatprep.mubr.bf16.mxu0 %v2700_v38  ;;  %v374_v37 = vmax.f32 %v182_v16, 0.0  ;;  %v375_v38 = vmax.f32 %v183_v23, 0.0  ;;  %v388_v47 = vmax.f32 %v196_v30, 0.0  ;;  %v475_v59 = vpack.c.bf16 %v357_v43, %v356_v42  ;;  %v2723_v23 = vld [vmem:[%s4236_s1 + $0x1f8] ss:$48 sps:$4 sm:$0xff]  }
  0x71   :  { %1413 = vmatprep.mubr.bf16.mxu1 %v2702_v45  ;;  %2514 = vmatpush3.bf16.msra.mxu0 %v471_v57  ;;  %v162_v45 = vld [vmem:[%s4235_s0 + $0x480] sm:$0xff]  ;;  %v372_v57 = vmax.f32 %v180_v39, 0.0  ;;  %v2747_v39 = vld [vmem:[%s4236_s1 + $0x88] ss:$48 sps:$4 sm:$0xff]  }
  0x72   :  { %2578 = vmatpush3.bf16.msra.mxu1 %v487_v61  ;;  %2515 = vmatprep.subr.bf16.mxu0 %v478_v62  ;;  %v484_v54 = vpack.c.bf16 %v375_v38, %v374_v37  ;;  %v354_v61 = vmax.f32 %v162_v45, 0.0  ;;  %v355_v62 = vmax.f32 %v163_v49, 0.0  ;;  %v491_v1 = vpack.c.bf16 %v389_v48, %v388_v47  ;;  %v2724_v24 = vld [vmem:[%s4236_s1 + $0x254] ss:$48 sps:$4 sm:$0xff]   ;;  %v2734_v30 = vld [vmem:[%s4236_s1 + $0x2b0] ss:$48 sps:$4 sm:$0xff]  }
  0x73   :  { %2579 = vmatprep.subr.bf16.mxu1 %v494_v3  ;;  %v387_v3 = vmax.f32 %v195_v52, 0.0  ;;  %v2730_v28 = vld [vmem:[%s4236_s1 + $0x2b4] ss:$48 sps:$4 sm:$0xff]   ;;  %v2745_v37 = vld [vmem:[%s4236_s1 + $0x8c] ss:$48 sps:$4 sm:$0xff]  }
  0x74   :  { %v2738_v32 = vld [vmem:[%s4236_s1 + $0x24] ss:$48 sps:$4 sm:$0xff]   ;;  %v2744_v38 = vld [vmem:[%s4236_s1 + $0x80] ss:$48 sps:$4 sm:$0xff]   ;;  %v2753_v43 = vld [vmem:[%s4236_s1 + $0xe8] ss:$48 sps:$4 sm:$0xff]  }
  0x75   :  { %2516 = vmatpush3.bf16.msra.mxu0 %v470_v9  ;;  %v338_v9 = vmax.f32 %v146_v63, 0.0  ;;  %v490_v15 = vpack.c.bf16 %v387_v3, %v386_v2  ;;  %v2750_v42 = vld [vmem:[%s4236_s1 + $0xe0] ss:$48 sps:$4 sm:$0xff]   ;;  %v2757_v45 = vld [vmem:[%s4236_s1 + $0x14c] ss:$48 sps:$4 sm:$0xff]  }
  0x76   :  { %2580 = vmatpush3.bf16.msra.mxu1 %v486_v12  ;;  %2517 = vmatprep.subr.bf16.mxu0 %v477_v19  ;;  %v474_v12 = vpack.c.bf16 %v355_v62, %v354_v61  ;;  %v2717_v19 = vld [vmem:[%s4236_s1 + $0x198] ss:$48 sps:$4 sm:$0xff]   ;;  %v2760_v48 = vld [vmem:[%s4236_s1 + $0x1a4] ss:$48 sps:$4 sm:$0xff]   ;;  %v2763_v49 = vld [vmem:[%s4236_s1 + $0x1ac] ss:$48 sps:$4 sm:$0xff]  }
  0x77   :  { %1317 = vmatmul.mubr.bf16.gmra.mxu0 %v2704_v11  ;;  %2581 = vmatprep.subr.bf16.mxu1 %v493_v26  ;;  %v483_v11 = vpack.c.bf16 %v373_v60, %v372_v57  ;;  %v466_v16 = vpack.c.bf16 %v339_v10, %v338_v9  ;;  %v2728_v26 = vld [vmem:[%s4236_s1 + $0x250] ss:$48 sps:$4 sm:$0xff]   ;;  %v2759_v47 = vld [vmem:[%s4236_s1 + $0x148] ss:$48 sps:$4 sm:$0xff]   ;;  %v2766_v52 = vld [vmem:[%s4236_s1 + $0x204] ss:$48 sps:$4 sm:$0xff]  }
  0x78   :  { %1414 = vmatmul.mubr.bf16.gmra.mxu1 %v2705_v17  ;;  %1324 = vmatprep.mubr.bf16.mxu0 %v2706_v18  ;;  %v482_v17 = vpack.c.bf16 %v371_v14, %v370_v13  ;;  %v2716_v18 = vld [vmem:[%s4236_s1 + $0x190] ss:$48 sps:$4 sm:$0xff]   ;;  %v2771_v55 = vld [vmem:[%s4236_s1 + $0x208] ss:$48 sps:$4 sm:$0xff]   ;;  %v2772_v56 = vld [vmem:[%s4236_s1 + $0x264] ss:$48 sps:$4 sm:$0xff]  }
  0x79   :  { %1421 = vmatprep.mubr.bf16.mxu1 %v2708_v25  ;;  %2518 = vmatpush3.bf16.msra.mxu0 %v469_v36  ;;  %v2726_v25 = vld [vmem:[%s4236_s1 + $0x25c] ss:$48 sps:$4 sm:$0xff]   ;;  %v2742_v36 = vld [vmem:[%s4236_s1 + $0x84] ss:$48 sps:$4 sm:$0xff]   ;;  %v2780_v62 = vld [vmem:[%s4236_s1 + $0x2c0] ss:$48 sps:$4 sm:$0xff]  }
  0x7a   :  { %2582 = vmatpush3.bf16.msra.mxu1 %v485_v40  ;;  %2519 = vmatprep.subr.bf16.mxu0 %v476_v41  ;;  %v2748_v40 = vld [vmem:[%s4236_s1 + $0xe4] ss:$48 sps:$4 sm:$0xff]   ;;  %v2751_v41 = vld [vmem:[%s4236_s1 + $0xec] ss:$48 sps:$4 sm:$0xff]   ;;  %v2783_v63 = vld [vmem:[%s4236_s1 + $0x2c8] ss:$48 sps:$4 sm:$0xff]  }
  0x7b   :  { %2583 = vmatprep.subr.bf16.mxu1 %v492_v46  ;;  %v2756_v46 = vld [vmem:[%s4236_s1 + $0x140] ss:$48 sps:$4 sm:$0xff]   ;;  %v2775_v57 = vld [vmem:[%s4236_s1 + $0x26c] ss:$48 sps:$4 sm:$0xff]   ;;  %v2778_v60 = vld [vmem:[%s4236_s1 + $0x2c4] ss:$48 sps:$4 sm:$0xff]  }
  0x7c   :  { %v2781_v61 = vld [vmem:[%s4236_s1 + $0x2cc] ss:$48 sps:$4 sm:$0xff]  }
  0x7d   :  { %2520 = vmatpush3.bf16.msra.mxu0 %v468_v51  ;;  %v2765_v51 = vld [vmem:[%s4236_s1 + $0x1a8] ss:$48 sps:$4 sm:$0xff]  }
  0x7e   :  { %2584 = vmatpush3.bf16.msra.mxu1 %v484_v54  ;;  %2521 = vmatprep.subr.bf16.mxu0 %v475_v59  ;;  %v2768_v54 = vld [vmem:[%s4236_s1 + $0x200] ss:$48 sps:$4 sm:$0xff]   ;;  %v2777_v59 = vld [vmem:[%s4236_s1 + $0x268] ss:$48 sps:$4 sm:$0xff]  }
  0x7f   :  { %1325 = vmatmul.mubr.bf16.gmra.mxu0 %v2710_v53  ;;  %2585 = vmatprep.subr.bf16.mxu1 %v491_v1  ;;  %v2769_v53 = vld [vmem:[%s4236_s1 + $0x20c] ss:$48 sps:$4 sm:$0xff]  }
  0x80   :  { %1422 = vmatmul.mubr.bf16.gmra.mxu1 %v2711_v58  ;;  %1332 = vmatprep.mubr.bf16.mxu0 %v2712_v6  ;;  %v2774_v58 = vld [vmem:[%s4236_s1 + $0x260] ss:$48 sps:$4 sm:$0xff]  }
  0x81   :  { %1429 = vmatprep.mubr.bf16.mxu1 %v2714_v7  ;;  %2522 = vmatpush3.bf16.msra.mxu0 %v467_v8 }
  0x82   :  { %2586 = vmatpush3.bf16.msra.mxu1 %v483_v11  ;;  %2523 = vmatprep.subr.bf16.mxu0 %v474_v12 }
  0x83   :  { %2587 = vmatprep.subr.bf16.mxu1 %v490_v15 }
  0x85   :  { %2524 = vmatpush3.bf16.msra.mxu0 %v466_v16 }
  0x86   :  { %2588 = vmatpush3.bf16.msra.mxu1 %v482_v17 }
  0x87   :  { %1333 = vmatmul.mubr.bf16.gmra.mxu0 %v2716_v18 }
  0x88   :  { %1430 = vmatmul.mubr.bf16.gmra.mxu1 %v2717_v19  ;;  %1340 = vmatprep.mubr.bf16.mxu0 %v2718_v20 }
  0x89   :  { %1437 = vmatprep.mubr.bf16.mxu1 %v2720_v21 }
  0x8f   :  { %1341 = vmatmul.mubr.bf16.gmra.mxu0 %v2722_v22 }
  0x90   :  { %1438 = vmatmul.mubr.bf16.gmra.mxu1 %v2723_v23  ;;  %1348 = vmatprep.mubr.bf16.mxu0 %v2724_v24 }
  0x91   :  { %1445 = vmatprep.mubr.bf16.mxu1 %v2726_v25 }
  0x97   :  { %1349 = vmatmul.mubr.bf16.gmra.mxu0 %v2728_v26 }
  0x98   :  { %1446 = vmatmul.mubr.bf16.gmra.mxu1 %v2729_v27  ;;  %1356 = vmatprep.mubr.bf16.mxu0 %v2730_v28 }
  0x99   :  { %1453 = vmatprep.mubr.bf16.mxu1 %v2732_v29 }
  0x9f   :  { %1357 = vmatmul.mubr.bf16.gmra.mxu0 %v2734_v30 }
  0xa0   :  { %1454 = vmatmul.mubr.bf16.gmra.mxu1 %v2735_v31  ;;  %1494 = vmatprep.mubr.bf16.mxu0 %v2738_v32 }
  0xa1   :  { %1591 = vmatprep.mubr.bf16.mxu1 %v2741_v33 }
  0xa7   :  { %1495 = vmatmul.mubr.bf16.vlgmr.msra.gmra.mxu0 %v2736_v34 }
  0xa8   :  { %1592 = vmatmul.mubr.bf16.vlgmr.msra.gmra.mxu1 %v2739_v35  ;;  %1502 = vmatprep.mubr.bf16.mxu0 %v2742_v36 }
  0xa9   :  { %1599 = vmatprep.mubr.bf16.mxu1 %v2745_v37 }
  0xaf   :  { %1503 = vmatmul.mubr.bf16.gmra.mxu0 %v2744_v38 }
  0xb0   :  { %1600 = vmatmul.mubr.bf16.gmra.mxu1 %v2747_v39  ;;  %1510 = vmatprep.mubr.bf16.mxu0 %v2748_v40 }
  0xb1   :  { %1607 = vmatprep.mubr.bf16.mxu1 %v2751_v41 }
  0xb7   :  { %1511 = vmatmul.mubr.bf16.gmra.mxu0 %v2750_v42 }
  0xb8   :  { %1608 = vmatmul.mubr.bf16.gmra.mxu1 %v2753_v43  ;;  %1518 = vmatprep.mubr.bf16.mxu0 %v2754_v44 }
  0xb9   :  { %1615 = vmatprep.mubr.bf16.mxu1 %v2757_v45 }
  0xbf   :  { %1519 = vmatmul.mubr.bf16.gmra.mxu0 %v2756_v46 }
  0xc0   :  { %1616 = vmatmul.mubr.bf16.gmra.mxu1 %v2759_v47  ;;  %1526 = vmatprep.mubr.bf16.mxu0 %v2760_v48 }
  0xc1   :  { %1623 = vmatprep.mubr.bf16.mxu1 %v2763_v49 }
  0xc7   :  { %1527 = vmatmul.mubr.bf16.gmra.mxu0 %v2762_v50 }
  0xc8   :  { %1624 = vmatmul.mubr.bf16.gmra.mxu1 %v2765_v51  ;;  %1534 = vmatprep.mubr.bf16.mxu0 %v2766_v52 }
  0xc9   :  { %1631 = vmatprep.mubr.bf16.mxu1 %v2769_v53 }
  0xcf   :  { %1535 = vmatmul.mubr.bf16.gmra.mxu0 %v2768_v54 }
  0xd0   :  { %1632 = vmatmul.mubr.bf16.gmra.mxu1 %v2771_v55  ;;  %1542 = vmatprep.mubr.bf16.mxu0 %v2772_v56 }
  0xd1   :  { %1639 = vmatprep.mubr.bf16.mxu1 %v2775_v57 }
  0xd7   :  { %1543 = vmatmul.mubr.bf16.gmra.mxu0 %v2774_v58 }
  0xd8   :  { %1640 = vmatmul.mubr.bf16.gmra.mxu1 %v2777_v59  ;;  %1550 = vmatprep.mubr.bf16.mxu0 %v2778_v60 }
  0xd9   :  { %1647 = vmatprep.mubr.bf16.mxu1 %v2781_v61 }
  0xdf   :  { %1551 = vmatmul.mubr.bf16.gmra.mxu0 %v2780_v62 }
  0xe0   :  { %1648 = vmatmul.mubr.bf16.gmra.mxu1 %v2783_v63 }
  0xe7   :  { %v2269_v0 = vpop.f32.mrf.mxu0 }
  0xe8   :  { %v2333_v1 = vpop.f32.mrf.mxu1 }
  0xe9   :  { %v2270_v2 = vpop.f32.mrf.mxu0 }
  0xea   :  { %v2271_v3 = vadd.f32 %v2270_v2, %v2269_v0  ;;  %v2334_v4 = vpop.f32.mrf.mxu1 }
  0xeb   :  { %v2335_v5 = vadd.f32 %v2334_v4, %v2333_v1  ;;  %v2272_v6 = vpop.f32.mrf.mxu0 }
  0xec   :  { %v2336_v7 = vpop.f32.mrf.mxu1 }
  0xed   :  { %v3709_v8 = vadd.f32 %v2335_v5, %v2271_v3  ;;  %v2273_v9 = vpop.f32.mrf.mxu0 }
  0xee   :  { %v2274_v10 = vadd.f32 %v2273_v9, %v2272_v6  ;;  %v2337_v11 = vpop.f32.mrf.mxu1 }
  0xef   :  { %v2338_v12 = vadd.f32 %v2337_v11, %v2336_v7  ;;  %v2275_v13 = vpop.f32.mrf.mxu0 }
  0xf0   :  { %v2339_v14 = vpop.f32.mrf.mxu1 }
  0xf1   :  { %v3711_v15 = vadd.f32 %v2338_v12, %v2274_v10  ;;  %v2276_v16 = vpop.f32.mrf.mxu0 }
  0xf2   :  { %v2277_v17 = vadd.f32 %v2276_v16, %v2275_v13  ;;  %v2340_v18 = vpop.f32.mrf.mxu1 }
  0xf3   :  { %v2341_v19 = vadd.f32 %v2340_v18, %v2339_v14  ;;  %v2278_v20 = vpop.f32.mrf.mxu0 }
  0xf4   :  { %v2342_v21 = vpop.f32.mrf.mxu1 }
  0xf5   :  { %v3713_v22 = vadd.f32 %v2341_v19, %v2277_v17  ;;  %v2279_v23 = vpop.f32.mrf.mxu0 }
  0xf6   :  { %v2280_v24 = vadd.f32 %v2279_v23, %v2278_v20  ;;  %v2343_v25 = vpop.f32.mrf.mxu1 }
  0xf7   :  { %v2344_v26 = vadd.f32 %v2343_v25, %v2342_v21  ;;  %v2281_v27 = vpop.f32.mrf.mxu0 }
  0xf8   :  { %v2345_v28 = vpop.f32.mrf.mxu1 }
  0xf9   :  { %v3715_v29 = vadd.f32 %v2344_v26, %v2280_v24  ;;  %v2282_v30 = vpop.f32.mrf.mxu0 }
  0xfa   :  { %v2283_v31 = vadd.f32 %v2282_v30, %v2281_v27  ;;  %v2346_v32 = vpop.f32.mrf.mxu1 }
  0xfb   :  { %v2347_v33 = vadd.f32 %v2346_v32, %v2345_v28  ;;  %v2284_v34 = vpop.f32.mrf.mxu0 }
  0xfc   :  { %v2348_v35 = vpop.f32.mrf.mxu1 }
  0xfd   :  { %v3717_v36 = vadd.f32 %v2347_v33, %v2283_v31  ;;  %v2285_v37 = vpop.f32.mrf.mxu0 }
  0xfe   :  { %v2286_v38 = vadd.f32 %v2285_v37, %v2284_v34  ;;  %v2349_v39 = vpop.f32.mrf.mxu1 }
  0xff   :  { %v2350_v40 = vadd.f32 %v2349_v39, %v2348_v35  ;;  %v2287_v41 = vpop.f32.mrf.mxu0 }
 0x100   :  { %v2351_v42 = vpop.f32.mrf.mxu1 }
 0x101   :  { %v3719_v43 = vadd.f32 %v2350_v40, %v2286_v38  ;;  %v2288_v44 = vpop.f32.mrf.mxu0 }
 0x102   :  { %v2289_v45 = vadd.f32 %v2288_v44, %v2287_v41  ;;  %v2352_v46 = vpop.f32.mrf.mxu1 }
 0x103   :  { %v2353_v47 = vadd.f32 %v2352_v46, %v2351_v42  ;;  %v2290_v48 = vpop.f32.mrf.mxu0 }
 0x104   :  { %v2354_v49 = vpop.f32.mrf.mxu1 }
 0x105   :  { %v3721_v50 = vadd.f32 %v2353_v47, %v2289_v45  ;;  %v2291_v51 = vpop.f32.mrf.mxu0 }
 0x106   :  { %v2292_v52 = vadd.f32 %v2291_v51, %v2290_v48  ;;  %v2355_v53 = vpop.f32.mrf.mxu1 }
 0x107   :  { %v2356_v54 = vadd.f32 %v2355_v53, %v2354_v49  ;;  %v2293_v55 = vpop.f32.mrf.mxu0 }
 0x108   :  { %v2357_v56 = vpop.f32.mrf.mxu1 }
 0x109   :  { %v3723_v57 = vadd.f32 %v2356_v54, %v2292_v52  ;;  %v2294_v58 = vpop.f32.mrf.mxu0 }
 0x10a   :  { %v2295_v59 = vadd.f32 %v2294_v58, %v2293_v55  ;;  %v2358_v60 = vpop.f32.mrf.mxu1 }
 0x10b   :  { %v2359_v61 = vadd.f32 %v2358_v60, %v2357_v56  ;;  %v2296_v62 = vpop.f32.mrf.mxu0 }
 0x10c   :  { %v2360_v63 = vpop.f32.mrf.mxu1 }
 0x10d   :  { %v3725_v0 = vadd.f32 %v2359_v61, %v2295_v59  ;;  %v2297_v1 = vpop.f32.mrf.mxu0 }
 0x10e   :  { %v2298_v2 = vadd.f32 %v2297_v1, %v2296_v62  ;;  %v2361_v3 = vpop.f32.mrf.mxu1 }
 0x10f   :  { %v2362_v4 = vadd.f32 %v2361_v3, %v2360_v63  ;;  %v2299_v5 = vpop.f32.mrf.mxu0 }
 0x110   :  { %v2363_v6 = vpop.f32.mrf.mxu1 }
 0x111   :  { %v3727_v7 = vadd.f32 %v2362_v4, %v2298_v2  ;;  %v2300_v9 = vpop.f32.mrf.mxu0 }
 0x112   :  { %v2301_v10 = vadd.f32 %v2300_v9, %v2299_v5  ;;  %v2364_v11 = vpop.f32.mrf.mxu1 }
 0x113   :  { %v2365_v12 = vadd.f32 %v2364_v11, %v2363_v6  ;;  %v2302_v13 = vpop.f32.mrf.mxu0 }
 0x114   :  { %v2366_v14 = vpop.f32.mrf.mxu1 }
 0x115   :  { %v3729_v16 = vadd.f32 %v2365_v12, %v2301_v10  ;;  %v2303_v17 = vpop.f32.mrf.mxu0 }
 0x116   :  { %v2304_v18 = vadd.f32 %v2303_v17, %v2302_v13  ;;  %v2367_v19 = vpop.f32.mrf.mxu1 }
 0x117   :  { %v2368_v20 = vadd.f32 %v2367_v19, %v2366_v14  ;;  %v2305_v21 = vpop.f32.mrf.mxu0 }
 0x118   :  { %v2369_v23 = vpop.f32.mrf.mxu1 }
 0x119   :  { %v3731_v24 = vadd.f32 %v2368_v20, %v2304_v18  ;;  %v2306_v25 = vpop.f32.mrf.mxu0 }
 0x11a   :  { %v2307_v26 = vadd.f32 %v2306_v25, %v2305_v21  ;;  %v2370_v27 = vpop.f32.mrf.mxu1 }
 0x11b   :  { %v2371_v28 = vadd.f32 %v2370_v27, %v2369_v23  ;;  %v2308_v30 = vpop.f32.mrf.mxu0 }
 0x11c   :  { %v2372_v31 = vpop.f32.mrf.mxu1 }
 0x11d   :  { %v3733_v32 = vadd.f32 %v2371_v28, %v2307_v26  ;;  %v2309_v33 = vpop.f32.mrf.mxu0 }
 0x11e   :  { %v2310_v34 = vadd.f32 %v2309_v33, %v2308_v30  ;;  %v2373_v35 = vpop.f32.mrf.mxu1 }
 0x11f   :  { %v2374_v37 = vadd.f32 %v2373_v35, %v2372_v31  ;;  %v2311_v38 = vpop.f32.mrf.mxu0 }
 0x120   :  { %v2375_v39 = vpop.f32.mrf.mxu1 }
 0x121   :  { %v3735_v40 = vadd.f32 %v2374_v37, %v2310_v34  ;;  %v2312_v41 = vpop.f32.mrf.mxu0 }
 0x122   :  { %v2313_v42 = vadd.f32 %v2312_v41, %v2311_v38  ;;  %v2376_v44 = vpop.f32.mrf.mxu1 }
 0x123   :  { %v2377_v45 = vadd.f32 %v2376_v44, %v2375_v39  ;;  %v2314_v46 = vpop.f32.mrf.mxu0 }
 0x124   :  { %v2378_v47 = vpop.f32.mrf.mxu1 }
 0x125   :  { %v3737_v48 = vadd.f32 %v2377_v45, %v2313_v42  ;;  %v2315_v49 = vpop.f32.mrf.mxu0 }
 0x126   :  { %v2316_v51 = vadd.f32 %v2315_v49, %v2314_v46  ;;  %v2379_v52 = vpop.f32.mrf.mxu1 }
 0x127   :  { %v2380_v53 = vadd.f32 %v2379_v52, %v2378_v47  ;;  %v3739_v54 = vpop.f32.mrf.mxu0 }
 0x128   :  { %v3741_v55 = vpop.f32.mrf.mxu1 }
 0x129   :  { %v3743_v56 = vadd.f32 %v2380_v53, %v2316_v51  ;;  %v3745_v58 = vpop.f32.mrf.mxu0 }
 0x12a   :  { %v3747_v59 = vpop.f32.mrf.mxu1 }
 0x12b   :  { %v3749_v60 = vpop.f32.mrf.mxu0 }
 0x12c   :  { %v3751_v61 = vpop.f32.mrf.mxu1 }
 0x12d   :  { %v3753_v62 = vpop.f32.mrf.mxu0 }
 0x12e   :  { %v3755_v63 = vpop.f32.mrf.mxu1 }
 0x12f   :  { %v2403_v1 = vpop.f32.mrf.mxu0 }
 0x130   :  { %v2467_v2 = vpop.f32.mrf.mxu1 }
 0x131   :  { %v2404_v3 = vpop.f32.mrf.mxu0 }
 0x132   :  { %v2405_v4 = vadd.f32 %v2404_v3, %v2403_v1  ;;  %v2468_v5 = vpop.f32.mrf.mxu1 }
 0x133   :  { %v2406_v6 = vpop.f32.mrf.mxu0  ;;  %v2469_v10 = vadd.f32 %v2468_v5, %v2467_v2 }
 0x134   :  { %v1311_v9 = vadd.f32 %v2405_v4, %v3713_v22  ;;  %v2470_v11 = vpop.f32.mrf.mxu1 }
 0x135   :  { %v2407_v12 = vpop.f32.mrf.mxu0 }
 0x136   :  { %v3758_v13 = vadd.f32 %v2469_v10, %v1311_v9  ;;  %v2408_v14 = vadd.f32 %v2407_v12, %v2406_v6  ;;  %v2471_v17 = vpop.f32.mrf.mxu1 }
 0x137   :  { %v3760_v18 = vpop.f32.mrf.mxu0  ;;  %v2472_v20 = vadd.f32 %v2471_v17, %v2470_v11 }
 0x138   :  { %v1314_v19 = vadd.f32 %v2408_v14, %v3715_v29  ;;  %v3763_v21 = vpop.f32.mrf.mxu1 }
 0x139   :  { %v3765_v23 = vpop.f32.mrf.mxu0 }
 0x13a   :  { %v3767_v25 = vadd.f32 %v2472_v20, %v1314_v19  ;;  %v3769_v26 = vpop.f32.mrf.mxu1 }
 0x13b   :  { %v2412_v22 = vpop.f32.mrf.mxu0 }
 0x13c   :  { %v2476_v27 = vpop.f32.mrf.mxu1 }
 0x13d   :  { %v2413_v28 = vpop.f32.mrf.mxu0 }
 0x13e   :  { %v2414_v30 = vadd.f32 %v2413_v28, %v2412_v22  ;;  %v2477_v31 = vpop.f32.mrf.mxu1 }
 0x13f   :  { %v3771_v33 = vpop.f32.mrf.mxu0  ;;  %v2478_v35 = vadd.f32 %v2477_v31, %v2476_v27 }
 0x140   :  { %v1322_v34 = vadd.f32 %v2414_v30, %v3719_v43  ;;  %v3774_v29 = vpop.f32.mrf.mxu1 }
 0x141   :  { %v3776_v37 = vpop.f32.mrf.mxu0 }
 0x142   :  { %v3778_v38 = vadd.f32 %v2478_v35, %v1322_v34  ;;  %v3780_v39 = vpop.f32.mrf.mxu1 }
 0x143   :  { %v2418_v41 = vpop.f32.mrf.mxu0 }
 0x144   :  { %v2482_v42 = vpop.f32.mrf.mxu1 }
 0x145   :  { %v2419_v44 = vpop.f32.mrf.mxu0 }
 0x146   :  { %v2420_v45 = vadd.f32 %v2419_v44, %v2418_v41  ;;  %v2483_v46 = vpop.f32.mrf.mxu1 }
 0x147   :  { %v3782_v47 = vpop.f32.mrf.mxu0  ;;  %v2484_v51 = vadd.f32 %v2483_v46, %v2482_v42 }
 0x148   :  { %v1330_v49 = vadd.f32 %v2420_v45, %v3723_v57  ;;  %v3785_v43 = vpop.f32.mrf.mxu1 }
 0x149   :  { %v3787_v52 = vpop.f32.mrf.mxu0 }
 0x14a   :  { %v3789_v53 = vadd.f32 %v2484_v51, %v1330_v49  ;;  %v3791_v1 = vpop.f32.mrf.mxu1 }
 0x14b   :  { %v2424_v2 = vpop.f32.mrf.mxu0 }
 0x14c   :  { %v2488_v3 = vpop.f32.mrf.mxu1 }
 0x14d   :  { %v2425_v4 = vpop.f32.mrf.mxu0 }
 0x14e   :  { %v2426_v5 = vadd.f32 %v2425_v4, %v2424_v2  ;;  %v2489_v6 = vpop.f32.mrf.mxu1 }
 0x14f   :  { %v3793_v9 = vpop.f32.mrf.mxu0  ;;  %v2490_v11 = vadd.f32 %v2489_v6, %v2488_v3  ;;  %v2399_v6 = vadd.f32 %v3745_v58, %v3739_v54 }
 0x150   :  { %v1338_v10 = vadd.f32 %v2426_v5, %v3727_v7  ;;  %v3796_v57 = vpop.f32.mrf.mxu1 }
 0x151   :  { %v3798_v12 = vpop.f32.mrf.mxu0 }
 0x152   :  { %v3800_v14 = vadd.f32 %v2490_v11, %v1338_v10  ;;  %v3802_v17 = vpop.f32.mrf.mxu1 }
 0x153   :  { %v2430_v19 = vpop.f32.mrf.mxu0 }
 0x154   :  { %v2494_v20 = vpop.f32.mrf.mxu1 }
 0x155   :  { %v2431_v22 = vpop.f32.mrf.mxu0 }
 0x156   :  { %v2432_v27 = vadd.f32 %v2431_v22, %v2430_v19  ;;  %v2495_v28 = vpop.f32.mrf.mxu1 }
 0x157   :  { %v3804_v30 = vpop.f32.mrf.mxu0  ;;  %v2496_v34 = vadd.f32 %v2495_v28, %v2494_v20 }
 0x158   :  { %v1346_v31 = vadd.f32 %v2432_v27, %v3731_v24  ;;  %v3807_v7 = vpop.f32.mrf.mxu1  ;;  %v1303_v27 = vadd.f32 %v2399_v6, %v3709_v8 }
 0x159   :  { %v3809_v35 = vpop.f32.mrf.mxu0 }
 0x15a   :  { %v3811_v41 = vadd.f32 %v2496_v34, %v1346_v31  ;;  %v3813_v42 = vpop.f32.mrf.mxu1 }
 0x15b   :  { %v2436_v44 = vpop.f32.mrf.mxu0 }
 0x15c   :  { %v2500_v45 = vpop.f32.mrf.mxu1 }
 0x15d   :  { %v2437_v46 = vpop.f32.mrf.mxu0 }
 0x15e   :  { %v2438_v49 = vadd.f32 %v2437_v46, %v2436_v44  ;;  %v2501_v51 = vpop.f32.mrf.mxu1  ;;  %v2463_v44 = vadd.f32 %v3747_v59, %v3741_v55 }
 0x15f   :  { %v3815_v2 = vpop.f32.mrf.mxu0  ;;  %v2502_v4 = vadd.f32 %v2501_v51, %v2500_v45 }
 0x160   :  { %v1354_v3 = vadd.f32 %v2438_v49, %v3735_v40  ;;  %v3818_v24 = vpop.f32.mrf.mxu1  ;;  %v2402_v40 = vadd.f32 %v3753_v62, %v3749_v60  ;;  %v1400_v49 = vadd.f32 %v2463_v44, %v1303_v27  ;;  %v2466_v60 = vadd.f32 %v3755_v63, %v3751_v61 }
 0x161   :  { %v3820_v5 = vpop.f32.mrf.mxu0  ;;  %v2411_v44 = vadd.f32 %v3765_v23, %v3760_v18 }
 0x162   :  { %v3824_v10 = vadd.f32 %v2502_v4, %v1354_v3  ;;  %v3826_v11 = vpop.f32.mrf.mxu1  ;;  %v1306_v51 = vadd.f32 %v2402_v40, %v3711_v15 }
 0x163   :  { %v2442_v19 = vpop.f32.mrf.mxu0 }
 0x164   :  { %v2506_v20 = vpop.f32.mrf.mxu1 }
 0x165   :  { %v2443_v22 = vpop.f32.mrf.mxu0 }
 0x166   :  { %v2444_v28 = vadd.f32 %v2443_v22, %v2442_v19  ;;  %v2507_v31 = vpop.f32.mrf.mxu1 }
 0x167   :  { %v2525_v34 = vpop.f32.mrf.mxu0  ;;  %v2508_v58 = vadd.f32 %v2507_v31, %v2506_v20 }
 0x168   :  { %v1362_v54 = vadd.f32 %v2444_v28, %v3743_v56  ;;  %v2589_v45 = vpop.f32.mrf.mxu1  ;;  %v1403_v56 = vadd.f32 %v2466_v60, %v1306_v51 }
 0x169   :  { %v2526_v46 = vpop.f32.mrf.mxu0 }
 0x16a   :  { %v3835_v3 = vadd.f32 %v2508_v58, %v1362_v54  ;;  %v2527_v8 = vadd.f32 %v2526_v46, %v2525_v34  ;;  %v2590_v4 = vpop.f32.mrf.mxu1 }
 0x16b   :  { %v2528_v6 = vpop.f32.mrf.mxu0  ;;  %v2591_v19 = vadd.f32 %v2590_v4, %v2589_v45 }
 0x16c   :  { %v1497_v62 = vadd.f32 %v2527_v8, %v1400_v49  ;;  %v2592_v22 = vpop.f32.mrf.mxu1 }
 0x16d   :  { %v2529_v55 = vpop.f32.mrf.mxu0 }
 0x16e   :  { %v3839_v59 = vadd.f32 %v2591_v19, %v1497_v62  ;;  %v2530_v20 = vadd.f32 %v2529_v55, %v2528_v6  ;;  %v2593_v27 = vpop.f32.mrf.mxu1  ;;  %v1319_v62 = vadd.f32 %v2411_v44, %v3717_v36 }
 0x16f   :  { %v2531_v28 = vpop.f32.mrf.mxu0  ;;  %v2594_v40 = vadd.f32 %v2593_v27, %v2592_v22 }
 0x170   :  { %v1500_v15 = vadd.f32 %v2530_v20, %v1403_v56  ;;  %v2595_v31 = vpop.f32.mrf.mxu1  ;;  %v1657_v34 = vsel %vm1656_vm0, %v3839_v59, 0.0  ;;  %v1705_v61 = vmul.f32 %v3839_v59, %v3839_v59 }
 0x171   :  { %v2532_v63 = vpop.f32.mrf.mxu0  ;;  %1658 = vadd.xlane.f32.xlu0 %v1657_v34 }
 0x172   :  { %v3847_v54 = vadd.f32 %v2594_v40, %v1500_v15  ;;  %v2533_v58 = vadd.f32 %v2532_v63, %v2531_v28  ;;  %v2596_v45 = vpop.f32.mrf.mxu1  ;;  %v1721_v4 = vsel %vm1656_vm0, %v1705_v61, 0.0  ;;  %v2417_v15 = vadd.f32 %v3776_v37, %v3771_v33 }
 0x173   :  { %v2534_v46 = vpop.f32.mrf.mxu0  ;;  %v2597_v49 = vadd.f32 %v2596_v45, %v2595_v31 }
 0x174   :  { %v1505_v51 = vadd.f32 %v2533_v58, %v3758_v13  ;;  %v2598_v8 = vpop.f32.mrf.mxu1  ;;  %v1706_v6 = vmul.f32 %v3847_v54, %v3847_v54  ;;  %v2475_v13 = vadd.f32 %v3769_v26, %v3763_v21  ;;  %v1660_v28 = vsel %vm1656_vm0, %v3847_v54, 0.0 }
 0x175   :  { %v2535_v60 = vpop.f32.mrf.mxu0  ;;  %1722 = vadd.xlane.f32.xlu0 %v1721_v4 }
 0x176   :  { %v3854_v19 = vadd.f32 %v2597_v49, %v1505_v51  ;;  %v2536_v18 = vadd.f32 %v2535_v60, %v2534_v46  ;;  %v2599_v23 = vpop.f32.mrf.mxu1  ;;  %v1724_v22 = vsel %vm1656_vm0, %v1706_v6, 0.0  ;;  %v1416_v31 = vadd.f32 %v2475_v13, %v1319_v62 }
 0x177   :  { %v2537_v55 = vpop.f32.mrf.mxu0  ;;  %v2600_v56 = vadd.f32 %v2599_v23, %v2598_v8  ;;  %1725 = vadd.xlane.f32.xlu1 %v1724_v22  ;;  %v1327_v46 = vadd.f32 %v2417_v15, %v3721_v50  ;;  %v2481_v62 = vadd.f32 %v3780_v39, %v3774_v29 }
 0x178   :  { %v1508_v20 = vadd.f32 %v2536_v18, %v3767_v25  ;;  %v2601_v27 = vpop.f32.mrf.mxu1  ;;  %v1707_v36 = vmul.f32 %v3854_v19, %v3854_v19  ;;  %v1663_v21 = vsel %vm1656_vm0, %v3854_v19, 0.0 }
 0x179   :  { %v2538_v40 = vpop.f32.mrf.mxu0  ;;  %1661 = vadd.xlane.f32.xlu0 %v1660_v28  ;;  %v1424_v13 = vadd.f32 %v2481_v62, %v1327_v46 }
 0x17a   :  { %v3866_v34 = vadd.f32 %v2600_v56, %v1508_v20  ;;  %v2539_v61 = vadd.f32 %v2538_v40, %v2537_v55  ;;  %v2602_v63 = vpop.f32.mrf.mxu1  ;;  %v1727_v45 = vsel %vm1656_vm0, %v1707_v36, 0.0  ;;  %v2423_v55 = vadd.f32 %v3787_v52, %v3782_v47 }
 0x17b   :  { %v2540_v25 = vpop.f32.mrf.mxu0  ;;  %v2603_v26 = vadd.f32 %v2602_v63, %v2601_v27  ;;  %1664 = vadd.xlane.f32.xlu1 %v1663_v21 }
 0x17c   :  { %v1513_v44 = vadd.f32 %v2539_v61, %v1416_v31  ;;  %v2604_v58 = vpop.f32.mrf.mxu1  ;;  %v1666_v8 = vsel %vm1656_vm0, %v3866_v34, 0.0  ;;  %v1708_v4 = vmul.f32 %v3866_v34, %v3866_v34  ;;  %v1335_v31 = vadd.f32 %v2423_v55, %v3725_v0 }
 0x17d   :  { %v2541_v33 = vpop.f32.mrf.mxu0  ;;  %1728 = vadd.xlane.f32.xlu0 %v1727_v45 }
 0x17e   :  { %v3872_v37 = vadd.f32 %v2603_v26, %v1513_v44  ;;  %v2542_v49 = vadd.f32 %v2541_v33, %v2540_v25  ;;  %v2605_v51 = vpop.f32.mrf.mxu1  ;;  %v1730_v29 = vsel %vm1656_vm0, %v1708_v4, 0.0 }
 0x17f   :  { %v2543_v6 = vpop.f32.mrf.mxu0  ;;  %v2606_v60 = vadd.f32 %v2605_v51, %v2604_v58  ;;  %1667 = vadd.xlane.f32.xlu1 %v1666_v8  ;;  %v2487_v58 = vadd.f32 %v3791_v1, %v3785_v43 }
 0x180   :  { %v1516_v50 = vadd.f32 %v2542_v49, %v3778_v38  ;;  %v2607_v18 = vpop.f32.mrf.mxu1  ;;  %v1669_v23 = vsel %vm1656_vm0, %v3872_v37, 0.0  ;;  %v1709_v22 = vmul.f32 %v3872_v37, %v3872_v37  ;;  %v2429_v49 = vadd.f32 %v3798_v12, %v3793_v9 }
 0x181   :  { %v2544_v56 = vpop.f32.mrf.mxu0  ;;  %1670 = vadd.xlane.f32.xlu0 %v1669_v23  ;;  %v1432_v8 = vadd.f32 %v2487_v58, %v1335_v31 }
 0x182   :  { %v3887_v20 = vadd.f32 %v2606_v60, %v1516_v50  ;;  %v2545_v27 = vadd.f32 %v2544_v56, %v2543_v6  ;;  %v2608_v28 = vpop.f32.mrf.mxu1  ;;  %v1733_v40 = vsel %vm1656_vm0, %v1709_v22, 0.0  ;;  %v1343_v23 = vadd.f32 %v2429_v49, %v3729_v16 }
 0x183   :  { %v2546_v38 = vpop.f32.mrf.mxu0  ;;  %v2609_v39 = vadd.f32 %v2608_v28, %v2607_v18  ;;  %1731 = vadd.xlane.f32.xlu1 %v1730_v29  ;;  %v2493_v29 = vadd.f32 %v3802_v17, %v3796_v57 }
 0x184   :  { %v1521_v36 = vadd.f32 %v2545_v27, %v1424_v13  ;;  %v2610_v15 = vpop.f32.mrf.mxu1  ;;  %v1672_v21 = vsel %vm1656_vm0, %v3887_v20, 0.0  ;;  %v1710_v25 = vmul.f32 %v3887_v20, %v3887_v20 }
 0x185   :  { %v2547_v61 = vpop.f32.mrf.mxu0  ;;  %1734 = vadd.xlane.f32.xlu0 %v1733_v40  ;;  %v1440_v31 = vadd.f32 %v2493_v29, %v1343_v23 }
 0x186   :  { %v3892_v47 = vadd.f32 %v2609_v39, %v1521_v36  ;;  %v2548_v52 = vadd.f32 %v2547_v61, %v2546_v38  ;;  %v2611_v63 = vpop.f32.mrf.mxu1  ;;  %v1736_v43 = vsel %vm1656_vm0, %v1710_v25, 0.0 }
 0x187   :  { %v2549_v26 = vpop.f32.mrf.mxu0  ;;  %v2612_v44 = vadd.f32 %v2611_v63, %v2610_v15  ;;  %1673 = vadd.xlane.f32.xlu1 %v1672_v21  ;;  %v2435_v15 = vadd.f32 %v3809_v35, %v3804_v30  ;;  %v2816_v30 = vmov 0  }
 0x188   :  { %v1524_v0 = vadd.f32 %v2548_v52, %v3789_v53  ;;  %v2613_v45 = vpop.f32.mrf.mxu1  ;;  %v1675_v46 = vsel %vm1656_vm0, %v3892_v47, 0.0  ;;  %v1711_v33 = vmul.f32 %v3892_v47, %v3892_v47  ;;  %2639 = vset.pattern.permute.xlu1 %v2816_v30  ;;  %2638 = vset.pattern.permute.xlu0 %v2816_v30 }
 0x189   :  { %v2550_v51 = vpop.f32.mrf.mxu0  ;;  %1676 = vadd.xlane.f32.xlu0 %v1675_v46 }
 0x18a   :  { %v3907_v4 = vadd.f32 %v2612_v44, %v1524_v0  ;;  %v2551_v6 = vadd.f32 %v2550_v51, %v2549_v26  ;;  %v2614_v60 = vpop.f32.mrf.mxu1  ;;  %v1739_v18 = vsel %vm1656_vm0, %v1711_v33, 0.0  ;;  %v1351_v44 = vadd.f32 %v2435_v15, %v3733_v32 }
 0x18b   :  { %v2552_v53 = vpop.f32.mrf.mxu0  ;;  %v2615_v1 = vadd.f32 %v2614_v60, %v2613_v45  ;;  %1737 = vadd.xlane.f32.xlu1 %v1736_v43  ;;  %v2499_v32 = vadd.f32 %v3813_v42, %v3807_v7 }
 0x18c   :  { %v1529_v62 = vadd.f32 %v2551_v6, %v1432_v8  ;;  %v2616_v50 = vpop.f32.mrf.mxu1  ;;  %v1678_v56 = vsel %vm1656_vm0, %v3907_v4, 0.0  ;;  %v1712_v13 = vmul.f32 %v3907_v4, %v3907_v4 }
 0x18d   :  { %v2553_v22 = vpop.f32.mrf.mxu0  ;;  %1740 = vadd.xlane.f32.xlu0 %v1739_v18 }
 0x18e   :  { %v3912_v9 = vadd.f32 %v2615_v1, %v1529_v62  ;;  %v2554_v12 = vadd.f32 %v2553_v22, %v2552_v53  ;;  %v2617_v55 = vpop.f32.mrf.mxu1  ;;  %v1742_v57 = vsel %vm1656_vm0, %v1712_v13, 0.0  ;;  %v2441_v53 = vadd.f32 %v3820_v5, %v3815_v2 }
 0x18f   :  { %v2555_v27 = vpop.f32.mrf.mxu0  ;;  %v2618_v28 = vadd.f32 %v2617_v55, %v2616_v50  ;;  %1679 = vadd.xlane.f32.xlu1 %v1678_v56  ;;  %v1448_v62 = vadd.f32 %v2499_v32, %v1351_v44 }
 0x190   :  { %v1532_v16 = vadd.f32 %v2554_v12, %v3800_v14  ;;  %v2619_v38 = vpop.f32.mrf.mxu1  ;;  %v1681_v39 = vsel %vm1656_vm0, %v3912_v9, 0.0  ;;  %v1713_v36 = vmul.f32 %v3912_v9, %v3912_v9  ;;  %v1359_v56 = vadd.f32 %v2441_v53, %v3737_v48 }
 0x191   :  { %v2556_v40 = vpop.f32.mrf.mxu0  ;;  %1682 = vadd.xlane.f32.xlu0 %v1681_v39  ;;  %v2505_v39 = vadd.f32 %v3826_v11, %v3818_v24 }
 0x192   :  { %v3927_v61 = vadd.f32 %v2618_v28, %v1532_v16  ;;  %v2557_v52 = vadd.f32 %v2556_v40, %v2555_v27  ;;  %v2620_v63 = vpop.f32.mrf.mxu1  ;;  %v1745_v26 = vsel %vm1656_vm0, %v1713_v36, 0.0 }
 0x193   :  { %v2558_v14 = vpop.f32.mrf.mxu0  ;;  %v2621_v17 = vadd.f32 %v2620_v63, %v2619_v38  ;;  %1743 = vadd.xlane.f32.xlu1 %v1742_v57 }
 0x194   :  { %v1537_v21 = vadd.f32 %v2557_v52, %v1440_v31  ;;  %v2622_v25 = vpop.f32.mrf.mxu1  ;;  %v1684_v46 = vsel %vm1656_vm0, %v3927_v61, 0.0  ;;  %v1714_v33 = vmul.f32 %v3927_v61, %v3927_v61  ;;  %v1456_v52 = vadd.f32 %v2505_v39, %v1359_v56 }
 0x195   :  { %v2559_v58 = vpop.f32.mrf.mxu0  ;;  %1746 = vadd.xlane.f32.xlu0 %v1745_v26 }
 0x196   :  { %v3932_v35 = vadd.f32 %v2621_v17, %v1537_v21  ;;  %v2560_v0 = vadd.f32 %v2559_v58, %v2558_v14  ;;  %v2623_v45 = vpop.f32.mrf.mxu1  ;;  %v1748_v7 = vsel %vm1656_vm0, %v1714_v33, 0.0 }
 0x197   :  { %v2561_v49 = vpop.f32.mrf.mxu0  ;;  %v2624_v51 = vadd.f32 %v2623_v45, %v2622_v25  ;;  %1685 = vadd.xlane.f32.xlu1 %v1684_v46 }
 0x198   :  { %v1540_v8 = vadd.f32 %v2560_v0, %v3811_v41  ;;  %v2625_v6 = vpop.f32.mrf.mxu1  ;;  %v1687_v60 = vsel %vm1656_vm0, %v3932_v35, 0.0  ;;  %v1715_v43 = vmul.f32 %v3932_v35, %v3932_v35 }
 0x199   :  { %v2562_v1 = vpop.f32.mrf.mxu0  ;;  %1688 = vadd.xlane.f32.xlu0 %v1687_v60 }
 0x19a   :  { %v3947_v50 = vadd.f32 %v2624_v51, %v1540_v8  ;;  %v2563_v18 = vadd.f32 %v2562_v1, %v2561_v49  ;;  %v2626_v23 = vpop.f32.mrf.mxu1  ;;  %v1751_v55 = vsel %vm1656_vm0, %v1715_v43, 0.0 }
 0x19b   :  { %v2564_v41 = vpop.f32.mrf.mxu0  ;;  %v2627_v42 = vadd.f32 %v2626_v23, %v2625_v6  ;;  %1749 = vadd.xlane.f32.xlu1 %v1748_v7 }
 0x19c   :  { %v1545_v22 = vadd.f32 %v2563_v18, %v1448_v62  ;;  %v2628_v12 = vpop.f32.mrf.mxu1  ;;  %v1690_v28 = vsel %vm1656_vm0, %v3947_v50, 0.0  ;;  %v1716_v29 = vmul.f32 %v3947_v50, %v3947_v50 }
 0x19d   :  { %v2565_v13 = vpop.f32.mrf.mxu0  ;;  %1752 = vadd.xlane.f32.xlu0 %v1751_v55 }
 0x19e   :  { %v3952_v2 = vadd.f32 %v2627_v42, %v1545_v22  ;;  %v2566_v5 = vadd.f32 %v2565_v13, %v2564_v41  ;;  %v2629_v27 = vpop.f32.mrf.mxu1  ;;  %v1754_v17 = vsel %vm1656_vm0, %v1716_v29, 0.0 }
 0x19f   :  { %v2567_v16 = vpop.f32.mrf.mxu0  ;;  %v2630_v38 = vadd.f32 %v2629_v27, %v2628_v12  ;;  %1691 = vadd.xlane.f32.xlu1 %v1690_v28 }
 0x1a0   :  { %v1548_v48 = vadd.f32 %v2566_v5, %v3824_v10  ;;  %v2631_v36 = vpop.f32.mrf.mxu1  ;;  %v1693_v15 = vsel %vm1656_vm0, %v3952_v2, 0.0  ;;  %v1717_v40 = vmul.f32 %v3952_v2, %v3952_v2 }
 0x1a1   :  { %v2568_v31 = vpop.f32.mrf.mxu0  ;;  %1694 = vadd.xlane.f32.xlu0 %v1693_v15 }
 0x1a2   :  { %v3965_v63 = vadd.f32 %v2630_v38, %v1548_v48  ;;  %v2569_v57 = vadd.f32 %v2568_v31, %v2567_v16  ;;  %v2632_v14 = vpop.f32.mrf.mxu1  ;;  %v1757_v25 = vsel %vm1656_vm0, %v1717_v40, 0.0 }
 0x1a3   :  { %v2570_v21 = vpop.f32.mrf.mxu0  ;;  %v2633_v24 = vadd.f32 %v2632_v14, %v2631_v36  ;;  %1755 = vadd.xlane.f32.xlu1 %v1754_v17 }
 0x1a4   :  { %v1553_v10 = vadd.f32 %v2569_v57, %v1456_v52  ;;  %v2634_v11 = vpop.f32.mrf.mxu1  ;;  %v1696_v0 = vsel %vm1656_vm0, %v3965_v63, 0.0  ;;  %v1718_v45 = vmul.f32 %v3965_v63, %v3965_v63 }
 0x1a5   :  { %v2571_v26 = vpop.f32.mrf.mxu0  ;;  %1758 = vadd.xlane.f32.xlu0 %v1757_v25 }
 0x1a6   :  { %v3969_v44 = vadd.f32 %v2633_v24, %v1553_v10  ;;  %v2572_v58 = vadd.f32 %v2571_v26, %v2570_v21  ;;  %v2635_v30 = vpop.f32.mrf.mxu1  ;;  %v1760_v8 = vsel %vm1656_vm0, %v1718_v45, 0.0  ;;  %v1865_v26 = vld [vmem:[%s4237_s2] sm:$0xff] }
 0x1a7   :  { %v2636_v46 = vadd.f32 %v2635_v30, %v2634_v11  ;;  %1697 = vadd.xlane.f32.xlu1 %v1696_v0 }
 0x1a8   :  { %v1556_v33 = vadd.f32 %v2572_v58, %v3835_v3  ;;  %v1699_v49 = vsel %vm1656_vm0, %v3969_v44, 0.0  ;;  %v1719_v51 = vmul.f32 %v3969_v44, %v3969_v44 }
 0x1a9   :  { %1700 = vadd.xlane.f32.xlu0 %v1699_v49 }
 0x1aa   :  { %v3980_v32 = vadd.f32 %v2636_v46, %v1556_v33  ;;  %v1763_v6 = vsel %vm1656_vm0, %v1719_v51, 0.0 }
 0x1ab   :  { %1761 = vadd.xlane.f32.xlu1 %v1760_v8  ;;  %v1866_v8 = vld [vmem:[%s4237_s2 + $0x8] sm:$0xff] }
 0x1ac   :  { %v1702_v60 = vsel %vm1656_vm0, %v3980_v32, 0.0  ;;  %v1720_v3 = vmul.f32 %v3980_v32, %v3980_v32 }
 0x1ad   :  { %1764 = vadd.xlane.f32.xlu0 %v1763_v6 }
 0x1ae   :  { %v1766_v43 = vsel %vm1656_vm0, %v1720_v3, 0.0 }
 0x1af   :  { %1703 = vadd.xlane.f32.xlu1 %v1702_v60 }
 0x1b3   :  { %1767 = vadd.xlane.f32.xlu1 %v1766_v43 }
 0x1fa   :  { %v1659_v53 = vpop.xlane.xlu0 %1658 }
 0x1fb   :  { %v1769_v1 = vmul.f32 0.020408163, %v1659_v53 }
 0x1fd   :  { %v1801_v18 = vmul.f32 %v1769_v1, %v1769_v1 }
 0x1fe   :  { %v1723_v62 = vpop.xlane.xlu0 %1722 }
 0x1ff   :  { %v1785_v23 = vmul.f32 0.020408163, %v1723_v62 }
 0x200   :  { %v1726_v7 = vpop.xlane.xlu1 %1725 }
 0x201   :  { %v1817_v41 = vsub.f32 %v1785_v23, %v1801_v18  ;;  %v1786_v56 = vmul.f32 0.020408163, %v1726_v7 }
 0x202   :  { %v1662_v42 = vpop.xlane.xlu0 %1661 }
 0x203   :  { %v1833_v22 = vadd.f32 1e-05, %v1817_v41  ;;  %v1770_v12 = vmul.f32 0.020408163, %v1662_v42 }
 0x204   :  { %v1665_v55 = vpop.xlane.xlu1 %1664 }
 0x205   :  { %2784 = vrsqrt.f32 %v1833_v22  ;;  %v1802_v13 = vmul.f32 %v1770_v12, %v1770_v12  ;;  %v3989_v5 = vmul.f32 0.020408163, %v1665_v55  ;;  %v1897_v22 = vld [vmem:[%s4238_s3] sm:$0xff]  ;;  %v1898_v55 = vld [vmem:[%s4238_s3 + $0x8] sm:$0xff] }
 0x206   :  { %v1729_v27 = vpop.xlane.xlu0 %1728 }
 0x207   :  { %v1818_v28 = vsub.f32 %v1786_v56, %v1802_v13  ;;  %v1803_v29 = vmul.f32 %v3989_v5, %v3989_v5  ;;  %v1787_v16 = vmul.f32 0.020408163, %v1729_v27 }
 0x208   :  { %v1668_v38 = vpop.xlane.xlu1 %1667 }
 0x209   :  { %v1834_v39 = vadd.f32 1e-05, %v1818_v28  ;;  %v1819_v48 = vsub.f32 %v1787_v16, %v1803_v29  ;;  %v3993_v36 = vmul.f32 0.020408163, %v1668_v38 }
 0x20a   :  { %v1671_v15 = vpop.xlane.xlu0 %1670 }
 0x20b   :  { %2786 = vrsqrt.f32 %v1834_v39  ;;  %v1835_v31 = vadd.f32 1e-05, %v1819_v48  ;;  %v1804_v52 = vmul.f32 %v3993_v36, %v3993_v36  ;;  %v3997_v14 = vmul.f32 0.020408163, %v1671_v15  ;;  %v1868_v15 = vld [vmem:[%s4237_s2 + $0x18] sm:$0xff] }
 0x20c   :  { %v1732_v40 = vpop.xlane.xlu1 %1731 }
 0x20d   :  { %v1788_v57 = vmul.f32 0.020408163, %v1732_v40  ;;  %2788 = vrsqrt.f32 %v1835_v31  ;;  %v1805_v30 = vmul.f32 %v3997_v14, %v3997_v14 }
 0x20e   :  { %v1735_v17 = vpop.xlane.xlu0 %1734 }
 0x20f   :  { %v1820_v21 = vsub.f32 %v1788_v57, %v1804_v52  ;;  %v1789_v24 = vmul.f32 0.020408163, %v1735_v17 }
 0x210   :  { %v1674_v10 = vpop.xlane.xlu1 %1673 }
 0x211   :  { %v1836_v11 = vadd.f32 1e-05, %v1820_v21  ;;  %v3999_v25 = vmul.f32 0.020408163, %v1674_v10  ;;  %v1821_v45 = vsub.f32 %v1789_v24, %v1805_v30 }
 0x212   :  { %v2785_v58 = vpop.eup %2784  ;;  %v1677_v0 = vpop.xlane.xlu0 %1676 }
 0x213   :  { %2790 = vrsqrt.f32 %v1836_v11  ;;  %v1881_v33 = vmul.f32 %v2785_v58, %v1865_v26  ;;  %v1806_v49 = vmul.f32 %v3999_v25, %v3999_v25  ;;  %v1837_v43 = vadd.f32 1e-05, %v1821_v45  ;;  %v1900_v58 = vld [vmem:[%s4238_s3 + $0x18] sm:$0xff] }
 0x214   :  { %v1738_v46 = vpop.xlane.xlu1 %1737  ;;  %v4013_v41 = vmul.f32 0.020408163, %v1677_v0 }
 0x215   :  { %v1790_v51 = vmul.f32 0.020408163, %v1738_v46  ;;  %1947 = vperm.xlu0 %2638, %v1881_v33   ;;  %v1913_v7 = vmul.f32 %v1881_v33, %v1769_v1 }
 0x216   :  { %v1741_v6 = vpop.xlane.xlu0 %1740  ;;  %v1807_v39 = vmul.f32 %v4013_v41, %v4013_v41 }
 0x217   :  { %v1822_v60 = vsub.f32 %v1790_v51, %v1806_v49  ;;  %v1791_v13 = vmul.f32 0.020408163, %v1741_v6  ;;  %v1929_v29 = vsub.f32 %v1897_v22, %v1913_v7 }
 0x218   :  { %v2787_v3 = vpop.eup %2786  ;;  %v1680_v53 = vpop.xlane.xlu1 %1679 }
 0x219   :  { %v1882_v62 = vmul.f32 %v2787_v3, %v1866_v8  ;;  %v1838_v18 = vadd.f32 1e-05, %v1822_v60  ;;  %v4011_v23 = vmul.f32 0.020408163, %v1680_v53  ;;  %v1823_v52 = vsub.f32 %v1791_v13, %v1807_v39  ;;  %v1899_v3 = vld [vmem:[%s4238_s3 + $0x10] sm:$0xff] }
 0x21a   :  { %v1683_v42 = vpop.xlane.xlu0 %1682  ;;  %v2789_v38 = vpop.eup %2788 }
 0x21b   :  { %v1914_v56 = vmul.f32 %v1882_v62, %v1770_v12  ;;  %2792 = vrsqrt.f32 %v1838_v18  ;;  %1952 = vperm.xlu1 %2639, %v1882_v62   ;;  %v1808_v1 = vmul.f32 %v4011_v23, %v4011_v23  ;;  %v1867_v12 = vld [vmem:[%s4237_s2 + $0x10] sm:$0xff]  ;;  %v4033_v11 = vmul.f32 0.020408163, %v1683_v42 }
 0x21c   :  { %2794 = vrsqrt.f32 %v1837_v43  ;;  %v1744_v27 = vpop.xlane.xlu1 %1743  ;;  %v1883_v24 = vmul.f32 %v2789_v38, %v1867_v12  ;;  %v1839_v30 = vadd.f32 1e-05, %v1823_v52  ;;  %v1870_v43 = vld [vmem:[%s4237_s2 + $0x28] sm:$0xff] }
 0x21d   :  { %v1792_v28 = vmul.f32 0.020408163, %v1744_v27  ;;  %v1930_v16 = vsub.f32 %v1898_v55, %v1914_v56  ;;  %v1809_v8 = vmul.f32 %v4033_v11, %v4033_v11  ;;  %v1869_v56 = vld [vmem:[%s4237_s2 + $0x20] sm:$0xff] }
 0x21e   :  { %v1747_v48 = vpop.xlane.xlu0 %1746  ;;  %v1915_v51 = vmul.f32 %v1883_v24, %v3989_v5 }
 0x21f   :  { %v1824_v40 = vsub.f32 %v1792_v28, %v1808_v1  ;;  %2043 = vperm.xlu1 %2639, %v1929_v29   ;;  %2048 = vperm.xlu0 %2638, %v1930_v16   ;;  %v1793_v0 = vmul.f32 0.020408163, %v1747_v48  ;;  %v1902_v1 = vld [vmem:[%s4238_s3 + $0x28] sm:$0xff] }
 0x220   :  { %v2791_v31 = vpop.eup %2790  ;;  %v1686_v57 = vpop.xlane.xlu1 %1685  ;;  %v1931_v22 = vsub.f32 %v1899_v3, %v1915_v51 }
 0x221   :  { %v1840_v17 = vadd.f32 1e-05, %v1824_v40  ;;  %v4031_v21 = vmul.f32 0.020408163, %v1686_v57  ;;  %v1884_v10 = vmul.f32 %v2791_v31, %v1868_v15  ;;  %v1825_v62 = vsub.f32 %v1793_v0, %v1809_v8  ;;  %v1872_v31 = vld [vmem:[%s4237_s2 + $0x38] sm:$0xff] }
 0x222   :  { %v1689_v26 = vpop.xlane.xlu0 %1688 }
 0x223   :  { %2796 = vrsqrt.f32 %v1840_v17  ;;  %1957 = vperm.xlu1 %2639, %v1883_v24   ;;  %v1916_v46 = vmul.f32 %v1884_v10, %v3993_v36  ;;  %v1810_v33 = vmul.f32 %v4031_v21, %v4031_v21  ;;  %v4055_v27 = vmul.f32 0.020408163, %v1689_v26 }
 0x224   :  { %v1750_v45 = vpop.xlane.xlu1 %1749  ;;  %2798 = vrsqrt.f32 %v1839_v30  ;;  %v1841_v28 = vadd.f32 1e-05, %v1825_v62 }
 0x225   :  { %v1794_v49 = vmul.f32 0.020408163, %v1750_v45  ;;  %v1932_v60 = vsub.f32 %v1900_v58, %v1916_v46  ;;  %v1811_v52 = vmul.f32 %v4055_v27, %v4055_v27  ;;  %v1901_v45 = vld [vmem:[%s4238_s3 + $0x20] sm:$0xff]  ;;  %v1904_v46 = vld [vmem:[%s4238_s3 + $0x38] sm:$0xff] }
 0x226   :  { %v1753_v6 = vpop.xlane.xlu0 %1752 }
 0x227   :  { %v1826_v36 = vsub.f32 %v1794_v49, %v1810_v33  ;;  %1962 = vperm.xlu1 %2639, %v1884_v10   ;;  %2058 = vperm.xlu0 %2638, %v1932_v60   ;;  %v1795_v39 = vmul.f32 0.020408163, %v1753_v6 }
 0x228   :  { %v2793_v53 = vpop.eup %2792  ;;  %v1692_v5 = vpop.xlane.xlu1 %1691 }
 0x229   :  { %v2795_v18 = vpop.eup %2794  ;;  %v1842_v7 = vadd.f32 1e-05, %v1826_v36  ;;  %v4050_v42 = vmul.f32 0.020408163, %v1692_v5  ;;  %v1886_v55 = vmul.f32 %v2793_v53, %v1870_v43  ;;  %v1827_v10 = vsub.f32 %v1795_v39, %v1811_v52  ;;  %v1871_v36 = vld [vmem:[%s4237_s2 + $0x30] sm:$0xff]  ;;  %v1874_v5 = vld [vmem:[%s4237_s2 + $0x48] sm:$0xff] }
 0x22a   :  { %v1695_v13 = vpop.xlane.xlu0 %1694  ;;  %v1885_v38 = vmul.f32 %v2795_v18, %v1869_v56 }
 0x22b   :  { %2800 = vrsqrt.f32 %v1842_v7  ;;  %2053 = vperm.xlu1 %2639, %v1931_v22   ;;  %v1918_v16 = vmul.f32 %v1886_v55, %v3999_v25  ;;  %v1812_v48 = vmul.f32 %v4050_v42, %v4050_v42  ;;  %v4071_v0 = vmul.f32 0.020408163, %v1695_v13 }
 0x22c   :  { %v1756_v29 = vpop.xlane.xlu1 %1755  ;;  %2802 = vrsqrt.f32 %v1841_v28  ;;  %v1917_v24 = vmul.f32 %v1885_v38, %v3997_v14  ;;  %v1843_v6 = vadd.f32 1e-05, %v1827_v10 }
 0x22d   :  { %v1796_v12 = vmul.f32 0.020408163, %v1756_v29  ;;  %v1934_v40 = vsub.f32 %v1902_v1, %v1918_v16  ;;  %v1813_v53 = vmul.f32 %v4071_v0, %v4071_v0  ;;  %v1906_v29 = vld [vmem:[%s4238_s3 + $0x48] sm:$0xff] }
 0x22e   :  { %v1759_v15 = vpop.xlane.xlu0 %1758  ;;  %v1933_v43 = vsub.f32 %v1901_v45, %v1917_v24 }
 0x22f   :  { %v1828_v57 = vsub.f32 %v1796_v12, %v1812_v48  ;;  %1967 = vperm.xlu1 %2639, %v1885_v38   ;;  %2068 = vperm.xlu0 %2638, %v1934_v40   ;;  %v1797_v33 = vmul.f32 0.020408163, %v1759_v15 }
 0x230   :  { %v2797_v17 = vpop.eup %2796  ;;  %v1698_v25 = vpop.xlane.xlu1 %1697 }
 0x231   :  { %v1844_v26 = vadd.f32 1e-05, %v1828_v57  ;;  %v4069_v58 = vmul.f32 0.020408163, %v1698_v25  ;;  %v1888_v30 = vmul.f32 %v2797_v17, %v1872_v31  ;;  %v2799_v8 = vpop.eup %2798  ;;  %v1829_v7 = vsub.f32 %v1797_v33, %v1813_v53  ;;  %v1903_v17 = vld [vmem:[%s4238_s3 + $0x30] sm:$0xff]  ;;  %v1876_v25 = vld [vmem:[%s4237_s2 + $0x58] sm:$0xff] }
 0x232   :  { %v1701_v49 = vpop.xlane.xlu0 %1700 }
 0x233   :  { %2804 = vrsqrt.f32 %v1844_v26  ;;  %1972 = vperm.xlu1 %2639, %v1886_v55   ;;  %v1920_v51 = vmul.f32 %v1888_v30, %v4011_v23  ;;  %v1814_v60 = vmul.f32 %v4069_v58, %v4069_v58  ;;  %v1887_v55 = vmul.f32 %v2799_v8, %v1871_v36  ;;  %v1875_v36 = vld [vmem:[%s4237_s2 + $0x50] sm:$0xff] }
 0x234   :  { %v1762_v14 = vpop.xlane.xlu1 %1761  ;;  %2806 = vrsqrt.f32 %v1843_v6  ;;  %v4095_v16 = vmul.f32 0.020408163, %v1701_v49  ;;  %v1845_v39 = vadd.f32 1e-05, %v1829_v7 }
 0x235   :  { %v1798_v3 = vmul.f32 0.020408163, %v1762_v14  ;;  %v1936_v62 = vsub.f32 %v1904_v46, %v1920_v51  ;;  %v1919_v12 = vmul.f32 %v1887_v55, %v4013_v41  ;;  %v1908_v14 = vld [vmem:[%s4238_s3 + $0x58] sm:$0xff] }
 0x236   :  { %v1765_v28 = vpop.xlane.xlu0 %1764  ;;  %v1815_v41 = vmul.f32 %v4095_v16, %v4095_v16 }
 0x237   :  { %v1830_v23 = vsub.f32 %v1798_v3, %v1814_v60  ;;  %2063 = vperm.xlu1 %2639, %v1933_v43   ;;  %2078 = vperm.xlu0 %2638, %v1936_v62   ;;  %v1799_v40 = vmul.f32 0.020408163, %v1765_v28  ;;  %v1935_v26 = vsub.f32 %v1903_v17, %v1919_v12  ;;  %v1878_v3 = vld [vmem:[%s4237_s2 + $0x68] sm:$0xff]  ;;  %v1905_v43 = vld [vmem:[%s4238_s3 + $0x40] sm:$0xff] }
 0x238   :  { %v2801_v18 = vpop.eup %2800  ;;  %v1704_v22 = vpop.xlane.xlu1 %1703 }
 0x239   :  { %v1846_v56 = vadd.f32 1e-05, %v1830_v23  ;;  %v4090_v13 = vmul.f32 0.020408163, %v1704_v22  ;;  %v1890_v1 = vmul.f32 %v2801_v18, %v1874_v5  ;;  %v2803_v15 = vpop.eup %2802  ;;  %v1831_v46 = vsub.f32 %v1799_v40, %v1815_v41  ;;  %v1910_v5 = vld [vmem:[%s4238_s3 + $0x68] sm:$0xff]  ;;  %v1909_v40 = vld [vmem:[%s4238_s3 + $0x60] sm:$0xff] }
 0x23b   :  { %2808 = vrsqrt.f32 %v1846_v56  ;;  %1977 = vperm.xlu1 %2639, %v1887_v55   ;;  %v1922_v38 = vmul.f32 %v1890_v1, %v4031_v21  ;;  %1992 = vperm.xlu0 %2638, %v1890_v1   ;;  %v1816_v31 = vmul.f32 %v4090_v13, %v4090_v13  ;;  %v1873_v21 = vld [vmem:[%s4237_s2 + $0x40] sm:$0xff]  ;;  %v1847_v8 = vadd.f32 1e-05, %v1831_v46  ;;  %v1880_v55 = vld [vmem:[%s4237_s2 + $0x78] sm:$0xff]  ;;  %v1907_v56 = vld [vmem:[%s4238_s3 + $0x50] sm:$0xff] }
 0x23c   :  { %v1768_v48 = vpop.xlane.xlu1 %1767  ;;  %v1889_v45 = vmul.f32 %v2803_v15, %v1873_v21  ;;  %2810 = vrsqrt.f32 %v1845_v39  ;;  %v1877_v1 = vld [vmem:[%s4237_s2 + $0x60] sm:$0xff] }
 0x23d   :  { %v1800_v52 = vmul.f32 0.020408163, %v1768_v48  ;;  %v1938_v57 = vsub.f32 %v1906_v29, %v1922_v38 }
 0x23f   :  { %v1832_v24 = vsub.f32 %v1800_v52, %v1816_v31  ;;  %1982 = vperm.xlu1 %2639, %v1888_v30   ;;  %2088 = vperm.xlu0 %2638, %v1938_v57   ;;  %v1921_v30 = vmul.f32 %v1889_v45, %v4033_v11  ;;  %v1879_v31 = vld [vmem:[%s4237_s2 + $0x70] sm:$0xff] }
 0x240   :  { %v2805_v10 = vpop.eup %2804 }
 0x241   :  { %v1848_v33 = vadd.f32 1e-05, %v1832_v24  ;;  %v1892_v49 = vmul.f32 %v2805_v10, %v1876_v25  ;;  %v2807_v60 = vpop.eup %2806  ;;  %v1937_v62 = vsub.f32 %v1905_v43, %v1921_v30 }
 0x242   :  { %v1891_v11 = vmul.f32 %v2807_v60, %v1875_v36 }
 0x243   :  { %2812 = vrsqrt.f32 %v1848_v33  ;;  %2073 = vperm.xlu1 %2639, %v1935_v26   ;;  %v1924_v51 = vmul.f32 %v1892_v49, %v4050_v42  ;;  %2002 = vperm.xlu0 %2638, %v1892_v49  }
 0x244   :  { %2814 = vrsqrt.f32 %v1847_v8  ;;  %v1923_v7 = vmul.f32 %v1891_v11, %v4055_v27  ;;  %v1912_v27 = vld [vmem:[%s4238_s3 + $0x78] sm:$0xff] }
 0x245   :  { %v1940_v6 = vsub.f32 %v1908_v14, %v1924_v51 }
 0x246   :  { %v1939_v29 = vsub.f32 %v1907_v56, %v1923_v7 }
 0x247   :  { %1987 = vperm.xlu1 %2639, %v1889_v45   ;;  %2098 = vperm.xlu0 %2638, %v1940_v6  }
 0x248   :  { %v2809_v42 = vpop.eup %2808 }
 0x249   :  { %v1894_v53 = vmul.f32 %v2809_v42, %v1878_v3  ;;  %v2811_v22 = vpop.eup %2810 }
 0x24a   :  { %v1893_v38 = vmul.f32 %v2811_v22, %v1877_v1 }
 0x24b   :  { %2083 = vperm.xlu1 %2639, %v1937_v62   ;;  %v1926_v23 = vmul.f32 %v1894_v53, %v4069_v58  ;;  %2012 = vperm.xlu0 %2638, %v1894_v53  }
 0x24c   :  { %v1925_v12 = vmul.f32 %v1893_v38, %v4071_v0  ;;  %v1911_v0 = vld [vmem:[%s4238_s3 + $0x70] sm:$0xff] }
 0x24d   :  { %v1942_v18 = vsub.f32 %v1910_v5, %v1926_v23 }
 0x24e   :  { %v1941_v52 = vsub.f32 %v1909_v40, %v1925_v12 }
 0x24f   :  { %1997 = vperm.xlu1 %2639, %v1891_v11   ;;  %2108 = vperm.xlu0 %2638, %v1942_v18  }
 0x250   :  { %v2813_v28 = vpop.eup %2812 }
 0x251   :  { %v1896_v58 = vmul.f32 %v2813_v28, %v1880_v55  ;;  %v2815_v15 = vpop.eup %2814 }
 0x252   :  { %v1895_v57 = vmul.f32 %v2815_v15, %v1879_v31 }
 0x253   :  { %2093 = vperm.xlu1 %2639, %v1939_v29   ;;  %v1928_v39 = vmul.f32 %v1896_v58, %v4090_v13  ;;  %2022 = vperm.xlu0 %2638, %v1896_v58  }
 0x254   :  { %v1927_v13 = vmul.f32 %v1895_v57, %v4095_v16 }
 0x255   :  { %v1944_v48 = vsub.f32 %v1912_v27, %v1928_v39 }
 0x256   :  { %v1943_v17 = vsub.f32 %v1911_v0, %v1927_v13 }
 0x257   :  { %2007 = vperm.xlu1 %2639, %v1893_v38   ;;  %2118 = vperm.xlu0 %2638, %v1944_v48  }
 0x25b   :  { %2103 = vperm.xlu1 %2639, %v1941_v52  }
 0x25f   :  { %2017 = vperm.xlu1 %2639, %v1895_v57  }
 0x263   :  { %2113 = vperm.xlu1 %2639, %v1943_v17  }
 0x290   :  { %v1948_v21 = vpop.permute.xlu0 %1947 }
 0x291   :  { %v2025_v41 = vmul.f32 %v1948_v21, %v3839_v59 }
 0x296   :  { %v1953_v25 = vpop.permute.xlu1 %1952 }
 0x297   :  { %v2026_v24 = vmul.f32 %v1953_v25, %v3847_v54 }
 0x29a   :  { %v2044_v10 = vpop.permute.xlu1 %2043  ;;  %v2049_v26 = vpop.permute.xlu0 %2048 }
 0x29b   :  { %v2121_v45 = vadd.f32 %v2044_v10, %v2025_v41  ;;  %v2122_v46 = vadd.f32 %v2049_v26, %v2026_v24 }
 0x29d   :  { %2137 = vst.msk [vmem:[%s4239_s4] sm:$0xff] %vm1656_vm0, %v2121_v45  ;;  %2138 = vst.msk [vmem:[%s4239_s4 + $0x8] sm:$0xff] %vm1656_vm0, %v2122_v46 }
 0x29e   :  { %v1958_v16 = vpop.permute.xlu1 %1957 }
 0x29f   :  { %v2027_v54 = vmul.f32 %v1958_v16, %v3854_v19 }
 0x2a2   :  { %v1963_v33 = vpop.permute.xlu1 %1962  ;;  %v2059_v49 = vpop.permute.xlu0 %2058 }
 0x2a3   :  { %v2028_v59 = vmul.f32 %v1963_v33, %v3866_v34 }
 0x2a5   :  { %v2124_v14 = vadd.f32 %v2059_v49, %v2028_v59 }
 0x2a6   :  { %v2054_v51 = vpop.permute.xlu1 %2053 }
 0x2a7   :  { %2140 = vst.msk [vmem:[%s4239_s4 + $0x18] sm:$0xff] %vm1656_vm0, %v2124_v14  ;;  %v2123_v8 = vadd.f32 %v2054_v51, %v2027_v54 }
 0x2a9   :  { %2139 = vst.msk [vmem:[%s4239_s4 + $0x10] sm:$0xff] %vm1656_vm0, %v2123_v8 }
 0x2aa   :  { %v1968_v6 = vpop.permute.xlu1 %1967  ;;  %v2069_v60 = vpop.permute.xlu0 %2068 }
 0x2ab   :  { %v2029_v19 = vmul.f32 %v1968_v6, %v3872_v37 }
 0x2ae   :  { %v1973_v30 = vpop.permute.xlu1 %1972 }
 0x2af   :  { %v2030_v34 = vmul.f32 %v1973_v30, %v3887_v20 }
 0x2b1   :  { %v2126_v3 = vadd.f32 %v2069_v60, %v2030_v34 }
 0x2b2   :  { %v2064_v43 = vpop.permute.xlu1 %2063  ;;  %v2079_v42 = vpop.permute.xlu0 %2078 }
 0x2b3   :  { %2142 = vst.msk [vmem:[%s4239_s4 + $0x28] sm:$0xff] %vm1656_vm0, %v2126_v3  ;;  %v2125_v36 = vadd.f32 %v2064_v43, %v2029_v19 }
 0x2b5   :  { %2141 = vst.msk [vmem:[%s4239_s4 + $0x20] sm:$0xff] %vm1656_vm0, %v2125_v36 }
 0x2b6   :  { %v1978_v53 = vpop.permute.xlu1 %1977  ;;  %v1993_v62 = vpop.permute.xlu0 %1992 }
 0x2b7   :  { %v2034_v20 = vmul.f32 %v1993_v62, %v3927_v61  ;;  %v2031_v18 = vmul.f32 %v1978_v53, %v3892_v47 }
 0x2ba   :  { %v1983_v11 = vpop.permute.xlu1 %1982  ;;  %v2089_v5 = vpop.permute.xlu0 %2088 }
 0x2bb   :  { %v2032_v37 = vmul.f32 %v1983_v11, %v3907_v4  ;;  %v2130_v23 = vadd.f32 %v2089_v5, %v2034_v20 }
 0x2bd   :  { %v2128_v7 = vadd.f32 %v2079_v42, %v2032_v37  ;;  %2146 = vst.msk [vmem:[%s4239_s4 + $0x48] sm:$0xff] %vm1656_vm0, %v2130_v23 }
 0x2be   :  { %v2074_v22 = vpop.permute.xlu1 %2073  ;;  %v2003_v55 = vpop.permute.xlu0 %2002 }
 0x2bf   :  { %2144 = vst.msk [vmem:[%s4239_s4 + $0x38] sm:$0xff] %vm1656_vm0, %v2128_v7  ;;  %v2127_v61 = vadd.f32 %v2074_v22, %v2031_v18  ;;  %v2036_v47 = vmul.f32 %v2003_v55, %v3947_v50 }
 0x2c1   :  { %2143 = vst.msk [vmem:[%s4239_s4 + $0x30] sm:$0xff] %vm1656_vm0, %v2127_v61 }
 0x2c2   :  { %v1988_v4 = vpop.permute.xlu1 %1987  ;;  %v2099_v56 = vpop.permute.xlu0 %2098 }
 0x2c3   :  { %v2132_v1 = vadd.f32 %v2099_v56, %v2036_v47  ;;  %v2033_v28 = vmul.f32 %v1988_v4, %v3912_v9 }
 0x2c5   :  { %2148 = vst.msk [vmem:[%s4239_s4 + $0x58] sm:$0xff] %vm1656_vm0, %v2132_v1 }
 0x2c6   :  { %v2084_v58 = vpop.permute.xlu1 %2083  ;;  %v2013_v38 = vpop.permute.xlu0 %2012 }
 0x2c7   :  { %v2129_v29 = vadd.f32 %v2084_v58, %v2033_v28  ;;  %v2038_v50 = vmul.f32 %v2013_v38, %v3965_v63 }
 0x2c9   :  { %2145 = vst.msk [vmem:[%s4239_s4 + $0x40] sm:$0xff] %vm1656_vm0, %v2129_v29 }
 0x2ca   :  { %v1998_v27 = vpop.permute.xlu1 %1997  ;;  %v2109_v39 = vpop.permute.xlu0 %2108 }
 0x2cb   :  { %v2134_v48 = vadd.f32 %v2109_v39, %v2038_v50  ;;  %v2035_v9 = vmul.f32 %v1998_v27, %v3932_v35 }
 0x2cd   :  { %2150 = vst.msk [vmem:[%s4239_s4 + $0x68] sm:$0xff] %vm1656_vm0, %v2134_v48 }
 0x2ce   :  { %v2094_v12 = vpop.permute.xlu1 %2093  ;;  %v2023_v40 = vpop.permute.xlu0 %2022 }
 0x2cf   :  { %v2131_v15 = vadd.f32 %v2094_v12, %v2035_v9  ;;  %v2040_v63 = vmul.f32 %v2023_v40, %v3980_v32 }
 0x2d1   :  { %2147 = vst.msk [vmem:[%s4239_s4 + $0x50] sm:$0xff] %vm1656_vm0, %v2131_v15 }
 0x2d2   :  { %v2008_v31 = vpop.permute.xlu1 %2007  ;;  %v2119_v52 = vpop.permute.xlu0 %2118 }
 0x2d3   :  { %v2136_v57 = vadd.f32 %v2119_v52, %v2040_v63  ;;  %v2037_v35 = vmul.f32 %v2008_v31, %v3952_v2 }
 0x2d5   :  { %2152 = vst.msk [vmem:[%s4239_s4 + $0x78] sm:$0xff] %vm1656_vm0, %v2136_v57 }
 0x2d6   :  { %v2104_v13 = vpop.permute.xlu1 %2103 }
 0x2d7   :  { %v2133_v0 = vadd.f32 %v2104_v13, %v2037_v35 }
 0x2d9   :  { %2149 = vst.msk [vmem:[%s4239_s4 + $0x60] sm:$0xff] %vm1656_vm0, %v2133_v0 }
 0x2da   :  { %v2018_v17 = vpop.permute.xlu1 %2017 }
 0x2db   :  { %v2039_v32 = vmul.f32 %v2018_v17, %v3969_v44 }
 0x2de   :  { %v2114_v21 = vpop.permute.xlu1 %2113 }
 0x2df   :  { %v2135_v25 = vadd.f32 %v2114_v21, %v2039_v32 }
 0x2e1   :  { %2151 = vst.msk [vmem:[%s4239_s4 + $0x70] sm:$0xff] %vm1656_vm0, %v2135_v25 }

</bundles_post_ra>
